<compile_context>
chip_gen: v6e
topology: v6e:2x2x1
jax: 0.10.0
libtpu: 0.0.40
codegen_flags: <defaults>
</compile_context>

<pallas_src>
import functools

import jax
import jax.numpy as jnp
from jax.experimental import pallas as pl
from jax.experimental.pallas import tpu as pltpu

KSIZE = 7          # spatial-attention conv kernel size (module default)
PAD = KSIZE // 2


def _cbam_kernel(x_ref, w1_ref, w2t_ref, wcol_ref, o_ref, *, W):
    # x_ref:    (1, C, H*W) VMEM, lane-dense, one batch element per grid step
    # w1_ref:   (Cr, C)     VMEM  fc weight 1 (rows lane-aligned with C)
    # w2t_ref:  (Cr, C)     VMEM  fc weight 2, pre-transposed in wrapper
    # wcol_ref: (49, 2, 1)  VMEM  per-tap [w_avg, w_max] weight columns
    # o_ref:    (1, C, H*W)
    Bb, C, HW = x_ref.shape
    Cr = w1_ref.shape[0]
    x = x_ref[...].astype(jnp.float32)

    # ---------------- Channel attention (VPU, exact f32) ----------------
    avg = jnp.sum(x, axis=-1) * (1.0 / HW)          # (Bb, C) single lane reduce
    mx = jnp.max(x, axis=-1)                        # (Bb, C)
    p = jnp.concatenate([avg, mx], axis=0)          # (2Bb, C) fused avg+max pass

    w1 = w1_ref[...]                                # (Cr, C)
    w2t = w2t_ref[...]                              # (Cr, C)
    y = jnp.zeros_like(p)                           # (2Bb, C)
    for r in range(Cr):                             # Cr is tiny (2): static unroll
        h_r = jnp.maximum(
            jnp.sum(p * w1[r:r + 1, :], axis=-1, keepdims=True), 0.0)  # (2Bb, 1)
        y = y + h_r * w2t[r:r + 1, :]               # (2Bb, C)
    ca = jax.nn.sigmoid(y[:Bb] + y[Bb:])            # (Bb, C)
    x1 = x * ca[:, :, None]                         # apply channel attention

    # ---------------- Spatial attention ----------------
    m_avg = jnp.sum(x1, axis=1) * (1.0 / C)         # (Bb, HW) mean over channels
    m_max = jnp.max(x1, axis=1)                     # (Bb, HW) max over channels

    # Zero "SAME" padding of the (H, W) map expressed in flat lane space:
    # a (di, dj) tap is a flat shift of di*W + dj; out-of-range rows read the
    # flat zero pad, out-of-range columns are killed by the per-dj mask.
    # Invariant: the flat pad must cover the max |di*W + dj| overshoot.
    padf = PAD * W + PAD
    assert padf >= PAD * W + PAD, "flat pad must cover the max tap overshoot"

    # Sublane-stack avg (rows :Bb) and max (rows Bb:) maps -> one tap loop.
    s = jnp.concatenate([m_avg, m_max], axis=0)     # (2Bb, HW)
    ps = jnp.pad(s, ((0, 0), (padf, padf)))         # (2Bb, HW + 2*padf)

    # Lane index -> map column index, for the 7 W-direction edge masks.
    w_idx = jax.lax.broadcasted_iota(jnp.int32, (1, HW), 1) % W
    masks = [((w_idx + (j - PAD) >= 0) & (w_idx + (j - PAD) < W)).astype(jnp.float32)
             for j in range(KSIZE)]

    acc = jnp.zeros((2 * Bb, HW), jnp.float32)
    for j in range(KSIZE):
        dj = j - PAD
        inner = jnp.zeros((2 * Bb, HW), jnp.float32)
        for i in range(KSIZE):
            k = i * KSIZE + j
            start = padf + (i - PAD) * W + dj       # static lane offset
            inner = inner + wcol_ref[k] * ps[:, start:start + HW]
        acc = acc + masks[j] * inner                # mask reused across i & both maps

    conv = acc[:Bb] + acc[Bb:]                      # avg-channel + max-channel taps
    sa = jax.nn.sigmoid(conv)                       # (Bb, HW)
    o_ref[...] = (x1 * sa[:, None, :]).astype(o_ref.dtype)


def cbam_block_pallas(x, w1, w2, w_sp):
    """x: (B, C, H, W); w1: (C//ratio, C); w2: (C, C//ratio); w_sp: (1, 2, 7, 7)."""
    B, C, H, W = x.shape
    Cr = w1.shape[0]
    HW = H * W
    nk = KSIZE * KSIZE

    x2 = x.reshape(B, C, HW)                               # lane-dense layout
    w1f = jnp.asarray(w1, jnp.float32)                     # (Cr, C)
    w2t = jnp.asarray(w2, jnp.float32).T                   # (Cr, C)

    wsp = jnp.asarray(w_sp, jnp.float32)
    w_avg = wsp[0, 0].reshape(nk)                          # (49,) avg-channel taps
    w_max = wsp[0, 1].reshape(nk)                          # (49,) max-channel taps
    # Per-tap weight column matching the [avg; max] sublane stacking (Bb = 1).
    wcols = jnp.stack([w_avg, w_max], axis=1)[:, :, None]  # (49, 2, 1)

    kernel = functools.partial(_cbam_kernel, W=W)

    out2 = pl.pallas_call(
        kernel,
        out_shape=jax.ShapeDtypeStruct((B, C, HW), x.dtype),
        grid=(B,),
        in_specs=[
            pl.BlockSpec((1, C, HW), lambda b: (b, 0, 0)),
            pl.BlockSpec((Cr, C), lambda b: (0, 0)),
            pl.BlockSpec((Cr, C), lambda b: (0, 0)),
            pl.BlockSpec((nk, 2, 1), lambda b: (0, 0, 0)),
        ],
        out_specs=pl.BlockSpec((1, C, HW), lambda b: (b, 0, 0)),
        compiler_params=pltpu.CompilerParams(
            dimension_semantics=("parallel",),
        ),
    )(x2, w1f, w2t, wcols)
    return out2.reshape(B, C, H, W)


def cbam_block_ref(x, w1, w2, w_sp):
    """Pure-JAX reference matching the PyTorch forward."""
    avg = x.mean(axis=(2, 3))                      # (B, C)
    mx = x.max(axis=(2, 3))                        # (B, C)

    def fc(v):
        return jnp.maximum(v @ w1.T, 0.0) @ w2.T

    ca = jax.nn.sigmoid(fc(avg) + fc(mx))[:, :, None, None]
    x1 = x * ca
    sa_in = jnp.stack([x1.mean(axis=1), x1.max(axis=1)], axis=1)   # (B, 2, H, W)
    conv = jax.lax.conv_general_dilated(
        sa_in, w_sp, window_strides=(1, 1), padding="SAME",
        dimension_numbers=("NCHW", "OIHW", "NCHW"))
    sa = jax.nn.sigmoid(conv)
    return x1 * sa


if __name__ == "__main__":
    # Module config: cbam_block(channel=16, ratio=8, kernel_size=7)
    B, C, H, W = 2, 16, 16, 16
    ratio = 8
    Cr = C // ratio

    key = jax.random.PRNGKey(0)
    kx, k1, k2, k3 = jax.random.split(key, 4)

    x = jax.random.normal(kx, (B, C, H, W), dtype=jnp.float32)
    # Shapes from the PyTorch __init__:
    #   ChannelAttention.fc[0]: Conv2d(C, C//8, 1, bias=False) -> (Cr, C)
    #   ChannelAttention.fc[2]: Conv2d(C//8, C, 1, bias=False) -> (C, Cr)
    #   SpatialAttention.conv1: Conv2d(2, 1, 7, padding=3, bias=False) -> (1, 2, 7, 7)
    w1 = jax.random.normal(k1, (Cr, C), dtype=jnp.float32) * 0.2
    w2 = jax.random.normal(k2, (C, Cr), dtype=jnp.float32) * 0.2
    w_sp = jax.random.normal(k3, (1, 2, KSIZE, KSIZE), dtype=jnp.float32) * 0.1

    out = cbam_block_pallas(x, w1, w2, w_sp)
    out = jax.block_until_ready(out)

    ref = cbam_block_ref(x, w1, w2, w_sp)
    assert out.shape == (B, C, H, W)
    assert jnp.allclose(out, ref, atol=1e-4, rtol=1e-4), (
        f"max abs err = {jnp.max(jnp.abs(out - ref))}")

    print("KERNEL_OK")
</pallas_src>

<mosaic_0001>
module attributes {stable_mosaic.version = 11 : i64} {
  func.func @_cbam_kernel(%arg0: i32, %arg1: memref<1x16x256xf32, #tpu.memory_space<vmem>>, %arg2: memref<2x16xf32, #tpu.memory_space<vmem>>, %arg3: memref<2x16xf32, #tpu.memory_space<vmem>>, %arg4: memref<49x2x1xf32, #tpu.memory_space<vmem>>, %arg5: memref<1x16x256xf32, #tpu.memory_space<vmem>>) attributes {dimension_semantics = [#tpu.dimension_semantics<parallel>], iteration_bounds = array<i64: 2>, scalar_prefetch = 0 : i64, scratch_operands = 0 : i64, tpu.core_type = #tpu.core_type<tc>, window_params = [{transform_indices = @transform_0, window_bounds = array<i64: 1, 16, 256>}, {pipeline_mode = #tpu.pipeline_mode<synchronous>, transform_indices = @transform_1, window_bounds = array<i64: 2, 16>}, {pipeline_mode = #tpu.pipeline_mode<synchronous>, transform_indices = @transform_2, window_bounds = array<i64: 2, 16>}, {pipeline_mode = #tpu.pipeline_mode<synchronous>, transform_indices = @transform_3, window_bounds = array<i64: 49, 2, 1>}, {transform_indices = @transform_4, window_bounds = array<i64: 1, 16, 256>}]} {
    %c0 = arith.constant 0 : index
    %c0_0 = arith.constant 0 : index
    %c0_1 = arith.constant 0 : index
    %0 = vector.load %arg1[%c0, %c0_0, %c0_1] : memref<1x16x256xf32, #tpu.memory_space<vmem>>, vector<1x16x256xf32>
    %cst = arith.constant dense<0.000000e+00> : vector<1x16xf32>
    %1 = vector.multi_reduction <add>, %0, %cst [2] : vector<1x16x256xf32> to vector<1x16xf32>
    %cst_2 = arith.constant 3.906250e-03 : f32
    %2 = vector.broadcast %cst_2 : f32 to vector<1x16xf32>
    %3 = arith.mulf %1, %2 : vector<1x16xf32>
    %cst_3 = arith.constant dense<0xFF800000> : vector<1x16xf32>
    %4 = vector.multi_reduction <maximumf>, %0, %cst_3 [2] : vector<1x16x256xf32> to vector<1x16xf32>
    %5 = tpu.concatenate %3, %4 in 0 : vector<1x16xf32>, vector<1x16xf32> -> vector<2x16xf32>
    %c0_4 = arith.constant 0 : index
    %c0_5 = arith.constant 0 : index
    %6 = vector.load %arg2[%c0_4, %c0_5] : memref<2x16xf32, #tpu.memory_space<vmem>>, vector<2x16xf32>
    %c0_6 = arith.constant 0 : index
    %c0_7 = arith.constant 0 : index
    %7 = vector.load %arg3[%c0_6, %c0_7] : memref<2x16xf32, #tpu.memory_space<vmem>>, vector<2x16xf32>
    %cst_8 = arith.constant 0.000000e+00 : f32
    %8 = vector.broadcast %cst_8 : f32 to vector<2x16xf32>
    %9 = vector.extract_strided_slice %6 {offsets = [0, 0], sizes = [1, 16], strides = [1, 1]} : vector<2x16xf32> to vector<1x16xf32>
    %10 = vector.broadcast %9 : vector<1x16xf32> to vector<2x16xf32>
    %11 = arith.mulf %5, %10 : vector<2x16xf32>
    %cst_9 = arith.constant dense<0.000000e+00> : vector<2xf32>
    %12 = vector.multi_reduction <add>, %11, %cst_9 [1] : vector<2x16xf32> to vector<2xf32>
    %13 = vector.shape_cast %12 : vector<2xf32> to vector<2x1xf32>
    %cst_10 = arith.constant 0.000000e+00 : f32
    %14 = vector.broadcast %cst_10 : f32 to vector<2x1xf32>
    %15 = arith.maximumf %13, %14 : vector<2x1xf32>
    %16 = vector.extract_strided_slice %7 {offsets = [0, 0], sizes = [1, 16], strides = [1, 1]} : vector<2x16xf32> to vector<1x16xf32>
    %17 = vector.broadcast %15 : vector<2x1xf32> to vector<2x16xf32>
    %18 = vector.broadcast %16 : vector<1x16xf32> to vector<2x16xf32>
    %19 = arith.mulf %17, %18 : vector<2x16xf32>
    %20 = arith.addf %8, %19 : vector<2x16xf32>
    %21 = vector.extract_strided_slice %6 {offsets = [1, 0], sizes = [1, 16], strides = [1, 1]} : vector<2x16xf32> to vector<1x16xf32>
    %22 = vector.broadcast %21 : vector<1x16xf32> to vector<2x16xf32>
    %23 = arith.mulf %5, %22 : vector<2x16xf32>
    %cst_11 = arith.constant dense<0.000000e+00> : vector<2xf32>
    %24 = vector.multi_reduction <add>, %23, %cst_11 [1] : vector<2x16xf32> to vector<2xf32>
    %25 = vector.shape_cast %24 : vector<2xf32> to vector<2x1xf32>
    %cst_12 = arith.constant 0.000000e+00 : f32
    %26 = vector.broadcast %cst_12 : f32 to vector<2x1xf32>
    %27 = arith.maximumf %25, %26 : vector<2x1xf32>
    %28 = vector.extract_strided_slice %7 {offsets = [1, 0], sizes = [1, 16], strides = [1, 1]} : vector<2x16xf32> to vector<1x16xf32>
    %29 = vector.broadcast %27 : vector<2x1xf32> to vector<2x16xf32>
    %30 = vector.broadcast %28 : vector<1x16xf32> to vector<2x16xf32>
    %31 = arith.mulf %29, %30 : vector<2x16xf32>
    %32 = arith.addf %20, %31 : vector<2x16xf32>
    %33 = vector.extract_strided_slice %32 {offsets = [0, 0], sizes = [1, 16], strides = [1, 1]} : vector<2x16xf32> to vector<1x16xf32>
    %34 = vector.extract_strided_slice %32 {offsets = [1, 0], sizes = [1, 16], strides = [1, 1]} : vector<2x16xf32> to vector<1x16xf32>
    %35 = arith.addf %33, %34 : vector<1x16xf32>
    %36 = arith.negf %35 : vector<1x16xf32>
    %37 = math.exp %36 : vector<1x16xf32>
    %cst_13 = arith.constant 1.000000e+00 : f32
    %38 = vector.broadcast %cst_13 : f32 to vector<1x16xf32>
    %39 = arith.addf %38, %37 : vector<1x16xf32>
    %40 = arith.divf %38, %39 : vector<1x16xf32>
    %41 = vector.shape_cast %40 : vector<1x16xf32> to vector<1x16x1xf32>
    %42 = vector.broadcast %41 : vector<1x16x1xf32> to vector<1x16x256xf32>
    %43 = arith.mulf %0, %42 : vector<1x16x256xf32>
    %cst_14 = arith.constant dense<0.000000e+00> : vector<1x256xf32>
    %44 = vector.multi_reduction <add>, %43, %cst_14 [1] : vector<1x16x256xf32> to vector<1x256xf32>
    %cst_15 = arith.constant 6.250000e-02 : f32
    %45 = vector.broadcast %cst_15 : f32 to vector<1x256xf32>
    %46 = arith.mulf %44, %45 : vector<1x256xf32>
    %cst_16 = arith.constant dense<0xFF800000> : vector<1x256xf32>
    %47 = vector.multi_reduction <maximumf>, %43, %cst_16 [1] : vector<1x16x256xf32> to vector<1x256xf32>
    %48 = tpu.concatenate %46, %47 in 0 : vector<1x256xf32>, vector<1x256xf32> -> vector<2x256xf32>
    %c0_i32 = arith.constant 0 : i32
    %49 = arith.sitofp %c0_i32 : i32 to f32
    %50 = vector.broadcast %49 : f32 to vector<2x51xf32>
    %51 = tpu.concatenate %50, %48 in 1 : vector<2x51xf32>, vector<2x256xf32> -> vector<2x307xf32>
    %52 = vector.broadcast %49 : f32 to vector<2x51xf32>
    %53 = tpu.concatenate %51, %52 in 1 : vector<2x307xf32>, vector<2x51xf32> -> vector<2x358xf32>
    %54 = tpu.iota {dimensions = array<i32: 1>} : vector<1x256xi32>
    %c16_i32 = arith.constant 16 : i32
    %c0_i32_17 = arith.constant 0 : i32
    %55 = arith.cmpi eq, %c16_i32, %c0_i32_17 : i32
    %c1_i32 = arith.constant 1 : i32
    %56 = arith.select %55, %c1_i32, %c16_i32 : i32
    %57 = vector.broadcast %56 : i32 to vector<1x256xi32>
    %58 = arith.remsi %54, %57 : vector<1x256xi32>
    %c0_i32_18 = arith.constant 0 : i32
    %59 = vector.broadcast %c0_i32_18 : i32 to vector<1x256xi32>
    %60 = arith.cmpi ne, %58, %59 : vector<1x256xi32>
    %c0_i32_19 = arith.constant 0 : i32
    %61 = vector.broadcast %c0_i32_19 : i32 to vector<1x256xi32>
    %62 = arith.cmpi slt, %58, %61 : vector<1x256xi32>
    %c0_i32_20 = arith.constant 0 : i32
    %63 = arith.cmpi slt, %56, %c0_i32_20 : i32
    %64 = vector.broadcast %63 : i1 to vector<1x256xi1>
    %65 = vector.broadcast %64 : vector<1x256xi1> to vector<1x256xi1>
    %66 = arith.xori %62, %65 : vector<1x256xi1>
    %67 = arith.andi %66, %60 : vector<1x256xi1>
    %68 = vector.broadcast %56 : i32 to vector<1x256xi32>
    %69 = arith.addi %58, %68 : vector<1x256xi32>
    %70 = arith.select %67, %69, %58 : vector<1x256xi1>, vector<1x256xi32>
    %c-3_i32 = arith.constant -3 : i32
    %71 = vector.broadcast %c-3_i32 : i32 to vector<1x256xi32>
    %72 = arith.addi %70, %71 : vector<1x256xi32>
    %c0_i32_21 = arith.constant 0 : i32
    %73 = vector.broadcast %c0_i32_21 : i32 to vector<1x256xi32>
    %74 = arith.cmpi sge, %72, %73 : vector<1x256xi32>
    %c-3_i32_22 = arith.constant -3 : i32
    %75 = vector.broadcast %c-3_i32_22 : i32 to vector<1x256xi32>
    %76 = arith.addi %70, %75 : vector<1x256xi32>
    %c16_i32_23 = arith.constant 16 : i32
    %77 = vector.broadcast %c16_i32_23 : i32 to vector<1x256xi32>
    %78 = arith.cmpi slt, %76, %77 : vector<1x256xi32>
    %79 = arith.andi %74, %78 : vector<1x256xi1>
    %80 = arith.extui %79 : vector<1x256xi1> to vector<1x256xi32>
    %81 = arith.sitofp %80 : vector<1x256xi32> to vector<1x256xf32>
    %c-2_i32 = arith.constant -2 : i32
    %82 = vector.broadcast %c-2_i32 : i32 to vector<1x256xi32>
    %83 = arith.addi %70, %82 : vector<1x256xi32>
    %c0_i32_24 = arith.constant 0 : i32
    %84 = vector.broadcast %c0_i32_24 : i32 to vector<1x256xi32>
    %85 = arith.cmpi sge, %83, %84 : vector<1x256xi32>
    %c-2_i32_25 = arith.constant -2 : i32
    %86 = vector.broadcast %c-2_i32_25 : i32 to vector<1x256xi32>
    %87 = arith.addi %70, %86 : vector<1x256xi32>
    %c16_i32_26 = arith.constant 16 : i32
    %88 = vector.broadcast %c16_i32_26 : i32 to vector<1x256xi32>
    %89 = arith.cmpi slt, %87, %88 : vector<1x256xi32>
    %90 = arith.andi %85, %89 : vector<1x256xi1>
    %91 = arith.extui %90 : vector<1x256xi1> to vector<1x256xi32>
    %92 = arith.sitofp %91 : vector<1x256xi32> to vector<1x256xf32>
    %c-1_i32 = arith.constant -1 : i32
    %93 = vector.broadcast %c-1_i32 : i32 to vector<1x256xi32>
    %94 = arith.addi %70, %93 : vector<1x256xi32>
    %c0_i32_27 = arith.constant 0 : i32
    %95 = vector.broadcast %c0_i32_27 : i32 to vector<1x256xi32>
    %96 = arith.cmpi sge, %94, %95 : vector<1x256xi32>
    %c-1_i32_28 = arith.constant -1 : i32
    %97 = vector.broadcast %c-1_i32_28 : i32 to vector<1x256xi32>
    %98 = arith.addi %70, %97 : vector<1x256xi32>
    %c16_i32_29 = arith.constant 16 : i32
    %99 = vector.broadcast %c16_i32_29 : i32 to vector<1x256xi32>
    %100 = arith.cmpi slt, %98, %99 : vector<1x256xi32>
    %101 = arith.andi %96, %100 : vector<1x256xi1>
    %102 = arith.extui %101 : vector<1x256xi1> to vector<1x256xi32>
    %103 = arith.sitofp %102 : vector<1x256xi32> to vector<1x256xf32>
    %c0_i32_30 = arith.constant 0 : i32
    %104 = vector.broadcast %c0_i32_30 : i32 to vector<1x256xi32>
    %105 = arith.addi %70, %104 : vector<1x256xi32>
    %c0_i32_31 = arith.constant 0 : i32
    %106 = vector.broadcast %c0_i32_31 : i32 to vector<1x256xi32>
    %107 = arith.cmpi sge, %105, %106 : vector<1x256xi32>
    %c0_i32_32 = arith.constant 0 : i32
    %108 = vector.broadcast %c0_i32_32 : i32 to vector<1x256xi32>
    %109 = arith.addi %70, %108 : vector<1x256xi32>
    %c16_i32_33 = arith.constant 16 : i32
    %110 = vector.broadcast %c16_i32_33 : i32 to vector<1x256xi32>
    %111 = arith.cmpi slt, %109, %110 : vector<1x256xi32>
    %112 = arith.andi %107, %111 : vector<1x256xi1>
    %113 = arith.extui %112 : vector<1x256xi1> to vector<1x256xi32>
    %114 = arith.sitofp %113 : vector<1x256xi32> to vector<1x256xf32>
    %c1_i32_34 = arith.constant 1 : i32
    %115 = vector.broadcast %c1_i32_34 : i32 to vector<1x256xi32>
    %116 = arith.addi %70, %115 : vector<1x256xi32>
    %c0_i32_35 = arith.constant 0 : i32
    %117 = vector.broadcast %c0_i32_35 : i32 to vector<1x256xi32>
    %118 = arith.cmpi sge, %116, %117 : vector<1x256xi32>
    %c1_i32_36 = arith.constant 1 : i32
    %119 = vector.broadcast %c1_i32_36 : i32 to vector<1x256xi32>
    %120 = arith.addi %70, %119 : vector<1x256xi32>
    %c16_i32_37 = arith.constant 16 : i32
    %121 = vector.broadcast %c16_i32_37 : i32 to vector<1x256xi32>
    %122 = arith.cmpi slt, %120, %121 : vector<1x256xi32>
    %123 = arith.andi %118, %122 : vector<1x256xi1>
    %124 = arith.extui %123 : vector<1x256xi1> to vector<1x256xi32>
    %125 = arith.sitofp %124 : vector<1x256xi32> to vector<1x256xf32>
    %c2_i32 = arith.constant 2 : i32
    %126 = vector.broadcast %c2_i32 : i32 to vector<1x256xi32>
    %127 = arith.addi %70, %126 : vector<1x256xi32>
    %c0_i32_38 = arith.constant 0 : i32
    %128 = vector.broadcast %c0_i32_38 : i32 to vector<1x256xi32>
    %129 = arith.cmpi sge, %127, %128 : vector<1x256xi32>
    %c2_i32_39 = arith.constant 2 : i32
    %130 = vector.broadcast %c2_i32_39 : i32 to vector<1x256xi32>
    %131 = arith.addi %70, %130 : vector<1x256xi32>
    %c16_i32_40 = arith.constant 16 : i32
    %132 = vector.broadcast %c16_i32_40 : i32 to vector<1x256xi32>
    %133 = arith.cmpi slt, %131, %132 : vector<1x256xi32>
    %134 = arith.andi %129, %133 : vector<1x256xi1>
    %135 = arith.extui %134 : vector<1x256xi1> to vector<1x256xi32>
    %136 = arith.sitofp %135 : vector<1x256xi32> to vector<1x256xf32>
    %c3_i32 = arith.constant 3 : i32
    %137 = vector.broadcast %c3_i32 : i32 to vector<1x256xi32>
    %138 = arith.addi %70, %137 : vector<1x256xi32>
    %c0_i32_41 = arith.constant 0 : i32
    %139 = vector.broadcast %c0_i32_41 : i32 to vector<1x256xi32>
    %140 = arith.cmpi sge, %138, %139 : vector<1x256xi32>
    %c3_i32_42 = arith.constant 3 : i32
    %141 = vector.broadcast %c3_i32_42 : i32 to vector<1x256xi32>
    %142 = arith.addi %70, %141 : vector<1x256xi32>
    %c16_i32_43 = arith.constant 16 : i32
    %143 = vector.broadcast %c16_i32_43 : i32 to vector<1x256xi32>
    %144 = arith.cmpi slt, %142, %143 : vector<1x256xi32>
    %145 = arith.andi %140, %144 : vector<1x256xi1>
    %146 = arith.extui %145 : vector<1x256xi1> to vector<1x256xi32>
    %147 = arith.sitofp %146 : vector<1x256xi32> to vector<1x256xf32>
    %cst_44 = arith.constant 0.000000e+00 : f32
    %148 = vector.broadcast %cst_44 : f32 to vector<2x256xf32>
    %cst_45 = arith.constant 0.000000e+00 : f32
    %149 = vector.broadcast %cst_45 : f32 to vector<2x256xf32>
    %c0_46 = arith.constant 0 : index
    %c0_47 = arith.constant 0 : index
    %c0_48 = arith.constant 0 : index
    %150 = vector.load %arg4[%c0_46, %c0_47, %c0_48] : memref<49x2x1xf32, #tpu.memory_space<vmem>>, vector<1x2x1xf32>
    %151 = vector.shape_cast %150 : vector<1x2x1xf32> to vector<2x1xf32>
    %152 = vector.extract_strided_slice %53 {offsets = [0, 0], sizes = [2, 256], strides = [1, 1]} : vector<2x358xf32> to vector<2x256xf32>
    %153 = vector.broadcast %151 : vector<2x1xf32> to vector<2x256xf32>
    %154 = arith.mulf %153, %152 : vector<2x256xf32>
    %155 = arith.addf %149, %154 : vector<2x256xf32>
    %c7 = arith.constant 7 : index
    %c0_49 = arith.constant 0 : index
    %c0_50 = arith.constant 0 : index
    %156 = vector.load %arg4[%c7, %c0_49, %c0_50] : memref<49x2x1xf32, #tpu.memory_space<vmem>>, vector<1x2x1xf32>
    %157 = vector.shape_cast %156 : vector<1x2x1xf32> to vector<2x1xf32>
    %158 = vector.extract_strided_slice %53 {offsets = [0, 16], sizes = [2, 256], strides = [1, 1]} : vector<2x358xf32> to vector<2x256xf32>
    %159 = vector.broadcast %157 : vector<2x1xf32> to vector<2x256xf32>
    %160 = arith.mulf %159, %158 : vector<2x256xf32>
    %161 = arith.addf %155, %160 : vector<2x256xf32>
    %c14 = arith.constant 14 : index
    %c0_51 = arith.constant 0 : index
    %c0_52 = arith.constant 0 : index
    %162 = vector.load %arg4[%c14, %c0_51, %c0_52] : memref<49x2x1xf32, #tpu.memory_space<vmem>>, vector<1x2x1xf32>
    %163 = vector.shape_cast %162 : vector<1x2x1xf32> to vector<2x1xf32>
    %164 = vector.extract_strided_slice %53 {offsets = [0, 32], sizes = [2, 256], strides = [1, 1]} : vector<2x358xf32> to vector<2x256xf32>
    %165 = vector.broadcast %163 : vector<2x1xf32> to vector<2x256xf32>
    %166 = arith.mulf %165, %164 : vector<2x256xf32>
    %167 = arith.addf %161, %166 : vector<2x256xf32>
    %c21 = arith.constant 21 : index
    %c0_53 = arith.constant 0 : index
    %c0_54 = arith.constant 0 : index
    %168 = vector.load %arg4[%c21, %c0_53, %c0_54] : memref<49x2x1xf32, #tpu.memory_space<vmem>>, vector<1x2x1xf32>
    %169 = vector.shape_cast %168 : vector<1x2x1xf32> to vector<2x1xf32>
    %170 = vector.extract_strided_slice %53 {offsets = [0, 48], sizes = [2, 256], strides = [1, 1]} : vector<2x358xf32> to vector<2x256xf32>
    %171 = vector.broadcast %169 : vector<2x1xf32> to vector<2x256xf32>
    %172 = arith.mulf %171, %170 : vector<2x256xf32>
    %173 = arith.addf %167, %172 : vector<2x256xf32>
    %c28 = arith.constant 28 : index
    %c0_55 = arith.constant 0 : index
    %c0_56 = arith.constant 0 : index
    %174 = vector.load %arg4[%c28, %c0_55, %c0_56] : memref<49x2x1xf32, #tpu.memory_space<vmem>>, vector<1x2x1xf32>
    %175 = vector.shape_cast %174 : vector<1x2x1xf32> to vector<2x1xf32>
    %176 = vector.extract_strided_slice %53 {offsets = [0, 64], sizes = [2, 256], strides = [1, 1]} : vector<2x358xf32> to vector<2x256xf32>
    %177 = vector.broadcast %175 : vector<2x1xf32> to vector<2x256xf32>
    %178 = arith.mulf %177, %176 : vector<2x256xf32>
    %179 = arith.addf %173, %178 : vector<2x256xf32>
    %c35 = arith.constant 35 : index
    %c0_57 = arith.constant 0 : index
    %c0_58 = arith.constant 0 : index
    %180 = vector.load %arg4[%c35, %c0_57, %c0_58] : memref<49x2x1xf32, #tpu.memory_space<vmem>>, vector<1x2x1xf32>
    %181 = vector.shape_cast %180 : vector<1x2x1xf32> to vector<2x1xf32>
    %182 = vector.extract_strided_slice %53 {offsets = [0, 80], sizes = [2, 256], strides = [1, 1]} : vector<2x358xf32> to vector<2x256xf32>
    %183 = vector.broadcast %181 : vector<2x1xf32> to vector<2x256xf32>
    %184 = arith.mulf %183, %182 : vector<2x256xf32>
    %185 = arith.addf %179, %184 : vector<2x256xf32>
    %c42 = arith.constant 42 : index
    %c0_59 = arith.constant 0 : index
    %c0_60 = arith.constant 0 : index
    %186 = vector.load %arg4[%c42, %c0_59, %c0_60] : memref<49x2x1xf32, #tpu.memory_space<vmem>>, vector<1x2x1xf32>
    %187 = vector.shape_cast %186 : vector<1x2x1xf32> to vector<2x1xf32>
    %188 = vector.extract_strided_slice %53 {offsets = [0, 96], sizes = [2, 256], strides = [1, 1]} : vector<2x358xf32> to vector<2x256xf32>
    %189 = vector.broadcast %187 : vector<2x1xf32> to vector<2x256xf32>
    %190 = arith.mulf %189, %188 : vector<2x256xf32>
    %191 = arith.addf %185, %190 : vector<2x256xf32>
    %192 = vector.broadcast %81 : vector<1x256xf32> to vector<2x256xf32>
    %193 = arith.mulf %192, %191 : vector<2x256xf32>
    %194 = arith.addf %148, %193 : vector<2x256xf32>
    %cst_61 = arith.constant 0.000000e+00 : f32
    %195 = vector.broadcast %cst_61 : f32 to vector<2x256xf32>
    %c1 = arith.constant 1 : index
    %c0_62 = arith.constant 0 : index
    %c0_63 = arith.constant 0 : index
    %196 = vector.load %arg4[%c1, %c0_62, %c0_63] : memref<49x2x1xf32, #tpu.memory_space<vmem>>, vector<1x2x1xf32>
    %197 = vector.shape_cast %196 : vector<1x2x1xf32> to vector<2x1xf32>
    %198 = vector.extract_strided_slice %53 {offsets = [0, 1], sizes = [2, 256], strides = [1, 1]} : vector<2x358xf32> to vector<2x256xf32>
    %199 = vector.broadcast %197 : vector<2x1xf32> to vector<2x256xf32>
    %200 = arith.mulf %199, %198 : vector<2x256xf32>
    %201 = arith.addf %195, %200 : vector<2x256xf32>
    %c8 = arith.constant 8 : index
    %c0_64 = arith.constant 0 : index
    %c0_65 = arith.constant 0 : index
    %202 = vector.load %arg4[%c8, %c0_64, %c0_65] : memref<49x2x1xf32, #tpu.memory_space<vmem>>, vector<1x2x1xf32>
    %203 = vector.shape_cast %202 : vector<1x2x1xf32> to vector<2x1xf32>
    %204 = vector.extract_strided_slice %53 {offsets = [0, 17], sizes = [2, 256], strides = [1, 1]} : vector<2x358xf32> to vector<2x256xf32>
    %205 = vector.broadcast %203 : vector<2x1xf32> to vector<2x256xf32>
    %206 = arith.mulf %205, %204 : vector<2x256xf32>
    %207 = arith.addf %201, %206 : vector<2x256xf32>
    %c15 = arith.constant 15 : index
    %c0_66 = arith.constant 0 : index
    %c0_67 = arith.constant 0 : index
    %208 = vector.load %arg4[%c15, %c0_66, %c0_67] : memref<49x2x1xf32, #tpu.memory_space<vmem>>, vector<1x2x1xf32>
    %209 = vector.shape_cast %208 : vector<1x2x1xf32> to vector<2x1xf32>
    %210 = vector.extract_strided_slice %53 {offsets = [0, 33], sizes = [2, 256], strides = [1, 1]} : vector<2x358xf32> to vector<2x256xf32>
    %211 = vector.broadcast %209 : vector<2x1xf32> to vector<2x256xf32>
    %212 = arith.mulf %211, %210 : vector<2x256xf32>
    %213 = arith.addf %207, %212 : vector<2x256xf32>
    %c22 = arith.constant 22 : index
    %c0_68 = arith.constant 0 : index
    %c0_69 = arith.constant 0 : index
    %214 = vector.load %arg4[%c22, %c0_68, %c0_69] : memref<49x2x1xf32, #tpu.memory_space<vmem>>, vector<1x2x1xf32>
    %215 = vector.shape_cast %214 : vector<1x2x1xf32> to vector<2x1xf32>
    %216 = vector.extract_strided_slice %53 {offsets = [0, 49], sizes = [2, 256], strides = [1, 1]} : vector<2x358xf32> to vector<2x256xf32>
    %217 = vector.broadcast %215 : vector<2x1xf32> to vector<2x256xf32>
    %218 = arith.mulf %217, %216 : vector<2x256xf32>
    %219 = arith.addf %213, %218 : vector<2x256xf32>
    %c29 = arith.constant 29 : index
    %c0_70 = arith.constant 0 : index
    %c0_71 = arith.constant 0 : index
    %220 = vector.load %arg4[%c29, %c0_70, %c0_71] : memref<49x2x1xf32, #tpu.memory_space<vmem>>, vector<1x2x1xf32>
    %221 = vector.shape_cast %220 : vector<1x2x1xf32> to vector<2x1xf32>
    %222 = vector.extract_strided_slice %53 {offsets = [0, 65], sizes = [2, 256], strides = [1, 1]} : vector<2x358xf32> to vector<2x256xf32>
    %223 = vector.broadcast %221 : vector<2x1xf32> to vector<2x256xf32>
    %224 = arith.mulf %223, %222 : vector<2x256xf32>
    %225 = arith.addf %219, %224 : vector<2x256xf32>
    %c36 = arith.constant 36 : index
    %c0_72 = arith.constant 0 : index
    %c0_73 = arith.constant 0 : index
    %226 = vector.load %arg4[%c36, %c0_72, %c0_73] : memref<49x2x1xf32, #tpu.memory_space<vmem>>, vector<1x2x1xf32>
    %227 = vector.shape_cast %226 : vector<1x2x1xf32> to vector<2x1xf32>
    %228 = vector.extract_strided_slice %53 {offsets = [0, 81], sizes = [2, 256], strides = [1, 1]} : vector<2x358xf32> to vector<2x256xf32>
    %229 = vector.broadcast %227 : vector<2x1xf32> to vector<2x256xf32>
    %230 = arith.mulf %229, %228 : vector<2x256xf32>
    %231 = arith.addf %225, %230 : vector<2x256xf32>
    %c43 = arith.constant 43 : index
    %c0_74 = arith.constant 0 : index
    %c0_75 = arith.constant 0 : index
    %232 = vector.load %arg4[%c43, %c0_74, %c0_75] : memref<49x2x1xf32, #tpu.memory_space<vmem>>, vector<1x2x1xf32>
    %233 = vector.shape_cast %232 : vector<1x2x1xf32> to vector<2x1xf32>
    %234 = vector.extract_strided_slice %53 {offsets = [0, 97], sizes = [2, 256], strides = [1, 1]} : vector<2x358xf32> to vector<2x256xf32>
    %235 = vector.broadcast %233 : vector<2x1xf32> to vector<2x256xf32>
    %236 = arith.mulf %235, %234 : vector<2x256xf32>
    %237 = arith.addf %231, %236 : vector<2x256xf32>
    %238 = vector.broadcast %92 : vector<1x256xf32> to vector<2x256xf32>
    %239 = arith.mulf %238, %237 : vector<2x256xf32>
    %240 = arith.addf %194, %239 : vector<2x256xf32>
    %cst_76 = arith.constant 0.000000e+00 : f32
    %241 = vector.broadcast %cst_76 : f32 to vector<2x256xf32>
    %c2 = arith.constant 2 : index
    %c0_77 = arith.constant 0 : index
    %c0_78 = arith.constant 0 : index
    %242 = vector.load %arg4[%c2, %c0_77, %c0_78] : memref<49x2x1xf32, #tpu.memory_space<vmem>>, vector<1x2x1xf32>
    %243 = vector.shape_cast %242 : vector<1x2x1xf32> to vector<2x1xf32>
    %244 = vector.extract_strided_slice %53 {offsets = [0, 2], sizes = [2, 256], strides = [1, 1]} : vector<2x358xf32> to vector<2x256xf32>
    %245 = vector.broadcast %243 : vector<2x1xf32> to vector<2x256xf32>
    %246 = arith.mulf %245, %244 : vector<2x256xf32>
    %247 = arith.addf %241, %246 : vector<2x256xf32>
    %c9 = arith.constant 9 : index
    %c0_79 = arith.constant 0 : index
    %c0_80 = arith.constant 0 : index
    %248 = vector.load %arg4[%c9, %c0_79, %c0_80] : memref<49x2x1xf32, #tpu.memory_space<vmem>>, vector<1x2x1xf32>
    %249 = vector.shape_cast %248 : vector<1x2x1xf32> to vector<2x1xf32>
    %250 = vector.extract_strided_slice %53 {offsets = [0, 18], sizes = [2, 256], strides = [1, 1]} : vector<2x358xf32> to vector<2x256xf32>
    %251 = vector.broadcast %249 : vector<2x1xf32> to vector<2x256xf32>
    %252 = arith.mulf %251, %250 : vector<2x256xf32>
    %253 = arith.addf %247, %252 : vector<2x256xf32>
    %c16 = arith.constant 16 : index
    %c0_81 = arith.constant 0 : index
    %c0_82 = arith.constant 0 : index
    %254 = vector.load %arg4[%c16, %c0_81, %c0_82] : memref<49x2x1xf32, #tpu.memory_space<vmem>>, vector<1x2x1xf32>
    %255 = vector.shape_cast %254 : vector<1x2x1xf32> to vector<2x1xf32>
    %256 = vector.extract_strided_slice %53 {offsets = [0, 34], sizes = [2, 256], strides = [1, 1]} : vector<2x358xf32> to vector<2x256xf32>
    %257 = vector.broadcast %255 : vector<2x1xf32> to vector<2x256xf32>
    %258 = arith.mulf %257, %256 : vector<2x256xf32>
    %259 = arith.addf %253, %258 : vector<2x256xf32>
    %c23 = arith.constant 23 : index
    %c0_83 = arith.constant 0 : index
    %c0_84 = arith.constant 0 : index
    %260 = vector.load %arg4[%c23, %c0_83, %c0_84] : memref<49x2x1xf32, #tpu.memory_space<vmem>>, vector<1x2x1xf32>
    %261 = vector.shape_cast %260 : vector<1x2x1xf32> to vector<2x1xf32>
    %262 = vector.extract_strided_slice %53 {offsets = [0, 50], sizes = [2, 256], strides = [1, 1]} : vector<2x358xf32> to vector<2x256xf32>
    %263 = vector.broadcast %261 : vector<2x1xf32> to vector<2x256xf32>
    %264 = arith.mulf %263, %262 : vector<2x256xf32>
    %265 = arith.addf %259, %264 : vector<2x256xf32>
    %c30 = arith.constant 30 : index
    %c0_85 = arith.constant 0 : index
    %c0_86 = arith.constant 0 : index
    %266 = vector.load %arg4[%c30, %c0_85, %c0_86] : memref<49x2x1xf32, #tpu.memory_space<vmem>>, vector<1x2x1xf32>
    %267 = vector.shape_cast %266 : vector<1x2x1xf32> to vector<2x1xf32>
    %268 = vector.extract_strided_slice %53 {offsets = [0, 66], sizes = [2, 256], strides = [1, 1]} : vector<2x358xf32> to vector<2x256xf32>
    %269 = vector.broadcast %267 : vector<2x1xf32> to vector<2x256xf32>
    %270 = arith.mulf %269, %268 : vector<2x256xf32>
    %271 = arith.addf %265, %270 : vector<2x256xf32>
    %c37 = arith.constant 37 : index
    %c0_87 = arith.constant 0 : index
    %c0_88 = arith.constant 0 : index
    %272 = vector.load %arg4[%c37, %c0_87, %c0_88] : memref<49x2x1xf32, #tpu.memory_space<vmem>>, vector<1x2x1xf32>
    %273 = vector.shape_cast %272 : vector<1x2x1xf32> to vector<2x1xf32>
    %274 = vector.extract_strided_slice %53 {offsets = [0, 82], sizes = [2, 256], strides = [1, 1]} : vector<2x358xf32> to vector<2x256xf32>
    %275 = vector.broadcast %273 : vector<2x1xf32> to vector<2x256xf32>
    %276 = arith.mulf %275, %274 : vector<2x256xf32>
    %277 = arith.addf %271, %276 : vector<2x256xf32>
    %c44 = arith.constant 44 : index
    %c0_89 = arith.constant 0 : index
    %c0_90 = arith.constant 0 : index
    %278 = vector.load %arg4[%c44, %c0_89, %c0_90] : memref<49x2x1xf32, #tpu.memory_space<vmem>>, vector<1x2x1xf32>
    %279 = vector.shape_cast %278 : vector<1x2x1xf32> to vector<2x1xf32>
    %280 = vector.extract_strided_slice %53 {offsets = [0, 98], sizes = [2, 256], strides = [1, 1]} : vector<2x358xf32> to vector<2x256xf32>
    %281 = vector.broadcast %279 : vector<2x1xf32> to vector<2x256xf32>
    %282 = arith.mulf %281, %280 : vector<2x256xf32>
    %283 = arith.addf %277, %282 : vector<2x256xf32>
    %284 = vector.broadcast %103 : vector<1x256xf32> to vector<2x256xf32>
    %285 = arith.mulf %284, %283 : vector<2x256xf32>
    %286 = arith.addf %240, %285 : vector<2x256xf32>
    %cst_91 = arith.constant 0.000000e+00 : f32
    %287 = vector.broadcast %cst_91 : f32 to vector<2x256xf32>
    %c3 = arith.constant 3 : index
    %c0_92 = arith.constant 0 : index
    %c0_93 = arith.constant 0 : index
    %288 = vector.load %arg4[%c3, %c0_92, %c0_93] : memref<49x2x1xf32, #tpu.memory_space<vmem>>, vector<1x2x1xf32>
    %289 = vector.shape_cast %288 : vector<1x2x1xf32> to vector<2x1xf32>
    %290 = vector.extract_strided_slice %53 {offsets = [0, 3], sizes = [2, 256], strides = [1, 1]} : vector<2x358xf32> to vector<2x256xf32>
    %291 = vector.broadcast %289 : vector<2x1xf32> to vector<2x256xf32>
    %292 = arith.mulf %291, %290 : vector<2x256xf32>
    %293 = arith.addf %287, %292 : vector<2x256xf32>
    %c10 = arith.constant 10 : index
    %c0_94 = arith.constant 0 : index
    %c0_95 = arith.constant 0 : index
    %294 = vector.load %arg4[%c10, %c0_94, %c0_95] : memref<49x2x1xf32, #tpu.memory_space<vmem>>, vector<1x2x1xf32>
    %295 = vector.shape_cast %294 : vector<1x2x1xf32> to vector<2x1xf32>
    %296 = vector.extract_strided_slice %53 {offsets = [0, 19], sizes = [2, 256], strides = [1, 1]} : vector<2x358xf32> to vector<2x256xf32>
    %297 = vector.broadcast %295 : vector<2x1xf32> to vector<2x256xf32>
    %298 = arith.mulf %297, %296 : vector<2x256xf32>
    %299 = arith.addf %293, %298 : vector<2x256xf32>
    %c17 = arith.constant 17 : index
    %c0_96 = arith.constant 0 : index
    %c0_97 = arith.constant 0 : index
    %300 = vector.load %arg4[%c17, %c0_96, %c0_97] : memref<49x2x1xf32, #tpu.memory_space<vmem>>, vector<1x2x1xf32>
    %301 = vector.shape_cast %300 : vector<1x2x1xf32> to vector<2x1xf32>
    %302 = vector.extract_strided_slice %53 {offsets = [0, 35], sizes = [2, 256], strides = [1, 1]} : vector<2x358xf32> to vector<2x256xf32>
    %303 = vector.broadcast %301 : vector<2x1xf32> to vector<2x256xf32>
    %304 = arith.mulf %303, %302 : vector<2x256xf32>
    %305 = arith.addf %299, %304 : vector<2x256xf32>
    %c24 = arith.constant 24 : index
    %c0_98 = arith.constant 0 : index
    %c0_99 = arith.constant 0 : index
    %306 = vector.load %arg4[%c24, %c0_98, %c0_99] : memref<49x2x1xf32, #tpu.memory_space<vmem>>, vector<1x2x1xf32>
    %307 = vector.shape_cast %306 : vector<1x2x1xf32> to vector<2x1xf32>
    %308 = vector.extract_strided_slice %53 {offsets = [0, 51], sizes = [2, 256], strides = [1, 1]} : vector<2x358xf32> to vector<2x256xf32>
    %309 = vector.broadcast %307 : vector<2x1xf32> to vector<2x256xf32>
    %310 = arith.mulf %309, %308 : vector<2x256xf32>
    %311 = arith.addf %305, %310 : vector<2x256xf32>
    %c31 = arith.constant 31 : index
    %c0_100 = arith.constant 0 : index
    %c0_101 = arith.constant 0 : index
    %312 = vector.load %arg4[%c31, %c0_100, %c0_101] : memref<49x2x1xf32, #tpu.memory_space<vmem>>, vector<1x2x1xf32>
    %313 = vector.shape_cast %312 : vector<1x2x1xf32> to vector<2x1xf32>
    %314 = vector.extract_strided_slice %53 {offsets = [0, 67], sizes = [2, 256], strides = [1, 1]} : vector<2x358xf32> to vector<2x256xf32>
    %315 = vector.broadcast %313 : vector<2x1xf32> to vector<2x256xf32>
    %316 = arith.mulf %315, %314 : vector<2x256xf32>
    %317 = arith.addf %311, %316 : vector<2x256xf32>
    %c38 = arith.constant 38 : index
    %c0_102 = arith.constant 0 : index
    %c0_103 = arith.constant 0 : index
    %318 = vector.load %arg4[%c38, %c0_102, %c0_103] : memref<49x2x1xf32, #tpu.memory_space<vmem>>, vector<1x2x1xf32>
    %319 = vector.shape_cast %318 : vector<1x2x1xf32> to vector<2x1xf32>
    %320 = vector.extract_strided_slice %53 {offsets = [0, 83], sizes = [2, 256], strides = [1, 1]} : vector<2x358xf32> to vector<2x256xf32>
    %321 = vector.broadcast %319 : vector<2x1xf32> to vector<2x256xf32>
    %322 = arith.mulf %321, %320 : vector<2x256xf32>
    %323 = arith.addf %317, %322 : vector<2x256xf32>
    %c45 = arith.constant 45 : index
    %c0_104 = arith.constant 0 : index
    %c0_105 = arith.constant 0 : index
    %324 = vector.load %arg4[%c45, %c0_104, %c0_105] : memref<49x2x1xf32, #tpu.memory_space<vmem>>, vector<1x2x1xf32>
    %325 = vector.shape_cast %324 : vector<1x2x1xf32> to vector<2x1xf32>
    %326 = vector.extract_strided_slice %53 {offsets = [0, 99], sizes = [2, 256], strides = [1, 1]} : vector<2x358xf32> to vector<2x256xf32>
    %327 = vector.broadcast %325 : vector<2x1xf32> to vector<2x256xf32>
    %328 = arith.mulf %327, %326 : vector<2x256xf32>
    %329 = arith.addf %323, %328 : vector<2x256xf32>
    %330 = vector.broadcast %114 : vector<1x256xf32> to vector<2x256xf32>
    %331 = arith.mulf %330, %329 : vector<2x256xf32>
    %332 = arith.addf %286, %331 : vector<2x256xf32>
    %cst_106 = arith.constant 0.000000e+00 : f32
    %333 = vector.broadcast %cst_106 : f32 to vector<2x256xf32>
    %c4 = arith.constant 4 : index
    %c0_107 = arith.constant 0 : index
    %c0_108 = arith.constant 0 : index
    %334 = vector.load %arg4[%c4, %c0_107, %c0_108] : memref<49x2x1xf32, #tpu.memory_space<vmem>>, vector<1x2x1xf32>
    %335 = vector.shape_cast %334 : vector<1x2x1xf32> to vector<2x1xf32>
    %336 = vector.extract_strided_slice %53 {offsets = [0, 4], sizes = [2, 256], strides = [1, 1]} : vector<2x358xf32> to vector<2x256xf32>
    %337 = vector.broadcast %335 : vector<2x1xf32> to vector<2x256xf32>
    %338 = arith.mulf %337, %336 : vector<2x256xf32>
    %339 = arith.addf %333, %338 : vector<2x256xf32>
    %c11 = arith.constant 11 : index
    %c0_109 = arith.constant 0 : index
    %c0_110 = arith.constant 0 : index
    %340 = vector.load %arg4[%c11, %c0_109, %c0_110] : memref<49x2x1xf32, #tpu.memory_space<vmem>>, vector<1x2x1xf32>
    %341 = vector.shape_cast %340 : vector<1x2x1xf32> to vector<2x1xf32>
    %342 = vector.extract_strided_slice %53 {offsets = [0, 20], sizes = [2, 256], strides = [1, 1]} : vector<2x358xf32> to vector<2x256xf32>
    %343 = vector.broadcast %341 : vector<2x1xf32> to vector<2x256xf32>
    %344 = arith.mulf %343, %342 : vector<2x256xf32>
    %345 = arith.addf %339, %344 : vector<2x256xf32>
    %c18 = arith.constant 18 : index
    %c0_111 = arith.constant 0 : index
    %c0_112 = arith.constant 0 : index
    %346 = vector.load %arg4[%c18, %c0_111, %c0_112] : memref<49x2x1xf32, #tpu.memory_space<vmem>>, vector<1x2x1xf32>
    %347 = vector.shape_cast %346 : vector<1x2x1xf32> to vector<2x1xf32>
    %348 = vector.extract_strided_slice %53 {offsets = [0, 36], sizes = [2, 256], strides = [1, 1]} : vector<2x358xf32> to vector<2x256xf32>
    %349 = vector.broadcast %347 : vector<2x1xf32> to vector<2x256xf32>
    %350 = arith.mulf %349, %348 : vector<2x256xf32>
    %351 = arith.addf %345, %350 : vector<2x256xf32>
    %c25 = arith.constant 25 : index
    %c0_113 = arith.constant 0 : index
    %c0_114 = arith.constant 0 : index
    %352 = vector.load %arg4[%c25, %c0_113, %c0_114] : memref<49x2x1xf32, #tpu.memory_space<vmem>>, vector<1x2x1xf32>
    %353 = vector.shape_cast %352 : vector<1x2x1xf32> to vector<2x1xf32>
    %354 = vector.extract_strided_slice %53 {offsets = [0, 52], sizes = [2, 256], strides = [1, 1]} : vector<2x358xf32> to vector<2x256xf32>
    %355 = vector.broadcast %353 : vector<2x1xf32> to vector<2x256xf32>
    %356 = arith.mulf %355, %354 : vector<2x256xf32>
    %357 = arith.addf %351, %356 : vector<2x256xf32>
    %c32 = arith.constant 32 : index
    %c0_115 = arith.constant 0 : index
    %c0_116 = arith.constant 0 : index
    %358 = vector.load %arg4[%c32, %c0_115, %c0_116] : memref<49x2x1xf32, #tpu.memory_space<vmem>>, vector<1x2x1xf32>
    %359 = vector.shape_cast %358 : vector<1x2x1xf32> to vector<2x1xf32>
    %360 = vector.extract_strided_slice %53 {offsets = [0, 68], sizes = [2, 256], strides = [1, 1]} : vector<2x358xf32> to vector<2x256xf32>
    %361 = vector.broadcast %359 : vector<2x1xf32> to vector<2x256xf32>
    %362 = arith.mulf %361, %360 : vector<2x256xf32>
    %363 = arith.addf %357, %362 : vector<2x256xf32>
    %c39 = arith.constant 39 : index
    %c0_117 = arith.constant 0 : index
    %c0_118 = arith.constant 0 : index
    %364 = vector.load %arg4[%c39, %c0_117, %c0_118] : memref<49x2x1xf32, #tpu.memory_space<vmem>>, vector<1x2x1xf32>
    %365 = vector.shape_cast %364 : vector<1x2x1xf32> to vector<2x1xf32>
    %366 = vector.extract_strided_slice %53 {offsets = [0, 84], sizes = [2, 256], strides = [1, 1]} : vector<2x358xf32> to vector<2x256xf32>
    %367 = vector.broadcast %365 : vector<2x1xf32> to vector<2x256xf32>
    %368 = arith.mulf %367, %366 : vector<2x256xf32>
    %369 = arith.addf %363, %368 : vector<2x256xf32>
    %c46 = arith.constant 46 : index
    %c0_119 = arith.constant 0 : index
    %c0_120 = arith.constant 0 : index
    %370 = vector.load %arg4[%c46, %c0_119, %c0_120] : memref<49x2x1xf32, #tpu.memory_space<vmem>>, vector<1x2x1xf32>
    %371 = vector.shape_cast %370 : vector<1x2x1xf32> to vector<2x1xf32>
    %372 = vector.extract_strided_slice %53 {offsets = [0, 100], sizes = [2, 256], strides = [1, 1]} : vector<2x358xf32> to vector<2x256xf32>
    %373 = vector.broadcast %371 : vector<2x1xf32> to vector<2x256xf32>
    %374 = arith.mulf %373, %372 : vector<2x256xf32>
    %375 = arith.addf %369, %374 : vector<2x256xf32>
    %376 = vector.broadcast %125 : vector<1x256xf32> to vector<2x256xf32>
    %377 = arith.mulf %376, %375 : vector<2x256xf32>
    %378 = arith.addf %332, %377 : vector<2x256xf32>
    %cst_121 = arith.constant 0.000000e+00 : f32
    %379 = vector.broadcast %cst_121 : f32 to vector<2x256xf32>
    %c5 = arith.constant 5 : index
    %c0_122 = arith.constant 0 : index
    %c0_123 = arith.constant 0 : index
    %380 = vector.load %arg4[%c5, %c0_122, %c0_123] : memref<49x2x1xf32, #tpu.memory_space<vmem>>, vector<1x2x1xf32>
    %381 = vector.shape_cast %380 : vector<1x2x1xf32> to vector<2x1xf32>
    %382 = vector.extract_strided_slice %53 {offsets = [0, 5], sizes = [2, 256], strides = [1, 1]} : vector<2x358xf32> to vector<2x256xf32>
    %383 = vector.broadcast %381 : vector<2x1xf32> to vector<2x256xf32>
    %384 = arith.mulf %383, %382 : vector<2x256xf32>
    %385 = arith.addf %379, %384 : vector<2x256xf32>
    %c12 = arith.constant 12 : index
    %c0_124 = arith.constant 0 : index
    %c0_125 = arith.constant 0 : index
    %386 = vector.load %arg4[%c12, %c0_124, %c0_125] : memref<49x2x1xf32, #tpu.memory_space<vmem>>, vector<1x2x1xf32>
    %387 = vector.shape_cast %386 : vector<1x2x1xf32> to vector<2x1xf32>
    %388 = vector.extract_strided_slice %53 {offsets = [0, 21], sizes = [2, 256], strides = [1, 1]} : vector<2x358xf32> to vector<2x256xf32>
    %389 = vector.broadcast %387 : vector<2x1xf32> to vector<2x256xf32>
    %390 = arith.mulf %389, %388 : vector<2x256xf32>
    %391 = arith.addf %385, %390 : vector<2x256xf32>
    %c19 = arith.constant 19 : index
    %c0_126 = arith.constant 0 : index
    %c0_127 = arith.constant 0 : index
    %392 = vector.load %arg4[%c19, %c0_126, %c0_127] : memref<49x2x1xf32, #tpu.memory_space<vmem>>, vector<1x2x1xf32>
    %393 = vector.shape_cast %392 : vector<1x2x1xf32> to vector<2x1xf32>
    %394 = vector.extract_strided_slice %53 {offsets = [0, 37], sizes = [2, 256], strides = [1, 1]} : vector<2x358xf32> to vector<2x256xf32>
    %395 = vector.broadcast %393 : vector<2x1xf32> to vector<2x256xf32>
    %396 = arith.mulf %395, %394 : vector<2x256xf32>
    %397 = arith.addf %391, %396 : vector<2x256xf32>
    %c26 = arith.constant 26 : index
    %c0_128 = arith.constant 0 : index
    %c0_129 = arith.constant 0 : index
    %398 = vector.load %arg4[%c26, %c0_128, %c0_129] : memref<49x2x1xf32, #tpu.memory_space<vmem>>, vector<1x2x1xf32>
    %399 = vector.shape_cast %398 : vector<1x2x1xf32> to vector<2x1xf32>
    %400 = vector.extract_strided_slice %53 {offsets = [0, 53], sizes = [2, 256], strides = [1, 1]} : vector<2x358xf32> to vector<2x256xf32>
    %401 = vector.broadcast %399 : vector<2x1xf32> to vector<2x256xf32>
    %402 = arith.mulf %401, %400 : vector<2x256xf32>
    %403 = arith.addf %397, %402 : vector<2x256xf32>
    %c33 = arith.constant 33 : index
    %c0_130 = arith.constant 0 : index
    %c0_131 = arith.constant 0 : index
    %404 = vector.load %arg4[%c33, %c0_130, %c0_131] : memref<49x2x1xf32, #tpu.memory_space<vmem>>, vector<1x2x1xf32>
    %405 = vector.shape_cast %404 : vector<1x2x1xf32> to vector<2x1xf32>
    %406 = vector.extract_strided_slice %53 {offsets = [0, 69], sizes = [2, 256], strides = [1, 1]} : vector<2x358xf32> to vector<2x256xf32>
    %407 = vector.broadcast %405 : vector<2x1xf32> to vector<2x256xf32>
    %408 = arith.mulf %407, %406 : vector<2x256xf32>
    %409 = arith.addf %403, %408 : vector<2x256xf32>
    %c40 = arith.constant 40 : index
    %c0_132 = arith.constant 0 : index
    %c0_133 = arith.constant 0 : index
    %410 = vector.load %arg4[%c40, %c0_132, %c0_133] : memref<49x2x1xf32, #tpu.memory_space<vmem>>, vector<1x2x1xf32>
    %411 = vector.shape_cast %410 : vector<1x2x1xf32> to vector<2x1xf32>
    %412 = vector.extract_strided_slice %53 {offsets = [0, 85], sizes = [2, 256], strides = [1, 1]} : vector<2x358xf32> to vector<2x256xf32>
    %413 = vector.broadcast %411 : vector<2x1xf32> to vector<2x256xf32>
    %414 = arith.mulf %413, %412 : vector<2x256xf32>
    %415 = arith.addf %409, %414 : vector<2x256xf32>
    %c47 = arith.constant 47 : index
    %c0_134 = arith.constant 0 : index
    %c0_135 = arith.constant 0 : index
    %416 = vector.load %arg4[%c47, %c0_134, %c0_135] : memref<49x2x1xf32, #tpu.memory_space<vmem>>, vector<1x2x1xf32>
    %417 = vector.shape_cast %416 : vector<1x2x1xf32> to vector<2x1xf32>
    %418 = vector.extract_strided_slice %53 {offsets = [0, 101], sizes = [2, 256], strides = [1, 1]} : vector<2x358xf32> to vector<2x256xf32>
    %419 = vector.broadcast %417 : vector<2x1xf32> to vector<2x256xf32>
    %420 = arith.mulf %419, %418 : vector<2x256xf32>
    %421 = arith.addf %415, %420 : vector<2x256xf32>
    %422 = vector.broadcast %136 : vector<1x256xf32> to vector<2x256xf32>
    %423 = arith.mulf %422, %421 : vector<2x256xf32>
    %424 = arith.addf %378, %423 : vector<2x256xf32>
    %cst_136 = arith.constant 0.000000e+00 : f32
    %425 = vector.broadcast %cst_136 : f32 to vector<2x256xf32>
    %c6 = arith.constant 6 : index
    %c0_137 = arith.constant 0 : index
    %c0_138 = arith.constant 0 : index
    %426 = vector.load %arg4[%c6, %c0_137, %c0_138] : memref<49x2x1xf32, #tpu.memory_space<vmem>>, vector<1x2x1xf32>
    %427 = vector.shape_cast %426 : vector<1x2x1xf32> to vector<2x1xf32>
    %428 = vector.extract_strided_slice %53 {offsets = [0, 6], sizes = [2, 256], strides = [1, 1]} : vector<2x358xf32> to vector<2x256xf32>
    %429 = vector.broadcast %427 : vector<2x1xf32> to vector<2x256xf32>
    %430 = arith.mulf %429, %428 : vector<2x256xf32>
    %431 = arith.addf %425, %430 : vector<2x256xf32>
    %c13 = arith.constant 13 : index
    %c0_139 = arith.constant 0 : index
    %c0_140 = arith.constant 0 : index
    %432 = vector.load %arg4[%c13, %c0_139, %c0_140] : memref<49x2x1xf32, #tpu.memory_space<vmem>>, vector<1x2x1xf32>
    %433 = vector.shape_cast %432 : vector<1x2x1xf32> to vector<2x1xf32>
    %434 = vector.extract_strided_slice %53 {offsets = [0, 22], sizes = [2, 256], strides = [1, 1]} : vector<2x358xf32> to vector<2x256xf32>
    %435 = vector.broadcast %433 : vector<2x1xf32> to vector<2x256xf32>
    %436 = arith.mulf %435, %434 : vector<2x256xf32>
    %437 = arith.addf %431, %436 : vector<2x256xf32>
    %c20 = arith.constant 20 : index
    %c0_141 = arith.constant 0 : index
    %c0_142 = arith.constant 0 : index
    %438 = vector.load %arg4[%c20, %c0_141, %c0_142] : memref<49x2x1xf32, #tpu.memory_space<vmem>>, vector<1x2x1xf32>
    %439 = vector.shape_cast %438 : vector<1x2x1xf32> to vector<2x1xf32>
    %440 = vector.extract_strided_slice %53 {offsets = [0, 38], sizes = [2, 256], strides = [1, 1]} : vector<2x358xf32> to vector<2x256xf32>
    %441 = vector.broadcast %439 : vector<2x1xf32> to vector<2x256xf32>
    %442 = arith.mulf %441, %440 : vector<2x256xf32>
    %443 = arith.addf %437, %442 : vector<2x256xf32>
    %c27 = arith.constant 27 : index
    %c0_143 = arith.constant 0 : index
    %c0_144 = arith.constant 0 : index
    %444 = vector.load %arg4[%c27, %c0_143, %c0_144] : memref<49x2x1xf32, #tpu.memory_space<vmem>>, vector<1x2x1xf32>
    %445 = vector.shape_cast %444 : vector<1x2x1xf32> to vector<2x1xf32>
    %446 = vector.extract_strided_slice %53 {offsets = [0, 54], sizes = [2, 256], strides = [1, 1]} : vector<2x358xf32> to vector<2x256xf32>
    %447 = vector.broadcast %445 : vector<2x1xf32> to vector<2x256xf32>
    %448 = arith.mulf %447, %446 : vector<2x256xf32>
    %449 = arith.addf %443, %448 : vector<2x256xf32>
    %c34 = arith.constant 34 : index
    %c0_145 = arith.constant 0 : index
    %c0_146 = arith.constant 0 : index
    %450 = vector.load %arg4[%c34, %c0_145, %c0_146] : memref<49x2x1xf32, #tpu.memory_space<vmem>>, vector<1x2x1xf32>
    %451 = vector.shape_cast %450 : vector<1x2x1xf32> to vector<2x1xf32>
    %452 = vector.extract_strided_slice %53 {offsets = [0, 70], sizes = [2, 256], strides = [1, 1]} : vector<2x358xf32> to vector<2x256xf32>
    %453 = vector.broadcast %451 : vector<2x1xf32> to vector<2x256xf32>
    %454 = arith.mulf %453, %452 : vector<2x256xf32>
    %455 = arith.addf %449, %454 : vector<2x256xf32>
    %c41 = arith.constant 41 : index
    %c0_147 = arith.constant 0 : index
    %c0_148 = arith.constant 0 : index
    %456 = vector.load %arg4[%c41, %c0_147, %c0_148] : memref<49x2x1xf32, #tpu.memory_space<vmem>>, vector<1x2x1xf32>
    %457 = vector.shape_cast %456 : vector<1x2x1xf32> to vector<2x1xf32>
    %458 = vector.extract_strided_slice %53 {offsets = [0, 86], sizes = [2, 256], strides = [1, 1]} : vector<2x358xf32> to vector<2x256xf32>
    %459 = vector.broadcast %457 : vector<2x1xf32> to vector<2x256xf32>
    %460 = arith.mulf %459, %458 : vector<2x256xf32>
    %461 = arith.addf %455, %460 : vector<2x256xf32>
    %c48 = arith.constant 48 : index
    %c0_149 = arith.constant 0 : index
    %c0_150 = arith.constant 0 : index
    %462 = vector.load %arg4[%c48, %c0_149, %c0_150] : memref<49x2x1xf32, #tpu.memory_space<vmem>>, vector<1x2x1xf32>
    %463 = vector.shape_cast %462 : vector<1x2x1xf32> to vector<2x1xf32>
    %464 = vector.extract_strided_slice %53 {offsets = [0, 102], sizes = [2, 256], strides = [1, 1]} : vector<2x358xf32> to vector<2x256xf32>
    %465 = vector.broadcast %463 : vector<2x1xf32> to vector<2x256xf32>
    %466 = arith.mulf %465, %464 : vector<2x256xf32>
    %467 = arith.addf %461, %466 : vector<2x256xf32>
    %468 = vector.broadcast %147 : vector<1x256xf32> to vector<2x256xf32>
    %469 = arith.mulf %468, %467 : vector<2x256xf32>
    %470 = arith.addf %424, %469 : vector<2x256xf32>
    %471 = vector.extract_strided_slice %470 {offsets = [0, 0], sizes = [1, 256], strides = [1, 1]} : vector<2x256xf32> to vector<1x256xf32>
    %472 = vector.extract_strided_slice %470 {offsets = [1, 0], sizes = [1, 256], strides = [1, 1]} : vector<2x256xf32> to vector<1x256xf32>
    %473 = arith.addf %471, %472 : vector<1x256xf32>
    %474 = arith.negf %473 : vector<1x256xf32>
    %475 = math.exp %474 : vector<1x256xf32>
    %cst_151 = arith.constant 1.000000e+00 : f32
    %476 = vector.broadcast %cst_151 : f32 to vector<1x256xf32>
    %477 = arith.addf %476, %475 : vector<1x256xf32>
    %478 = arith.divf %476, %477 : vector<1x256xf32>
    %479 = vector.shape_cast %478 : vector<1x256xf32> to vector<1x1x256xf32>
    %480 = vector.broadcast %479 : vector<1x1x256xf32> to vector<1x16x256xf32>
    %481 = arith.mulf %43, %480 : vector<1x16x256xf32>
    %c0_152 = arith.constant 0 : index
    %c0_153 = arith.constant 0 : index
    %c0_154 = arith.constant 0 : index
    %482 = vector.load %arg5[%c0_152, %c0_153, %c0_154] : memref<1x16x256xf32, #tpu.memory_space<vmem>>, vector<1x16x256xf32>
    tpu.vector_store %arg5[%c0_152, %c0_153, %c0_154], %481 {strides = array<i32>} : memref<1x16x256xf32, #tpu.memory_space<vmem>>, vector<1x16x256xf32>,
    return
  }
  func.func @transform_0(%arg0: i32) -> (i32, i32, i32) {
    %c0_i32 = arith.constant 0 : i32
    %c0_i32_0 = arith.constant 0 : i32
    %c0_i32_1 = arith.constant 0 : i32
    return %arg0, %c0_i32, %c0_i32_0 : i32, i32, i32
  }
  func.func @transform_1(%arg0: i32) -> (i32, i32) {
    %c0_i32 = arith.constant 0 : i32
    %c0_i32_0 = arith.constant 0 : i32
    %c0_i32_1 = arith.constant 0 : i32
    return %c0_i32, %c0_i32_0 : i32, i32
  }
  func.func @transform_2(%arg0: i32) -> (i32, i32) {
    %c0_i32 = arith.constant 0 : i32
    %c0_i32_0 = arith.constant 0 : i32
    %c0_i32_1 = arith.constant 0 : i32
    return %c0_i32, %c0_i32_0 : i32, i32
  }
  func.func @transform_3(%arg0: i32) -> (i32, i32, i32) {
    %c0_i32 = arith.constant 0 : i32
    %c0_i32_0 = arith.constant 0 : i32
    %c0_i32_1 = arith.constant 0 : i32
    %c0_i32_2 = arith.constant 0 : i32
    return %c0_i32, %c0_i32_0, %c0_i32_1 : i32, i32, i32
  }
  func.func @transform_4(%arg0: i32) -> (i32, i32, i32) {
    %c0_i32 = arith.constant 0 : i32
    %c0_i32_0 = arith.constant 0 : i32
    %c0_i32_1 = arith.constant 0 : i32
    return %arg0, %c0_i32, %c0_i32_0 : i32, i32, i32
  }
}

</mosaic_0001>

<bundles_post_ra>
// kernel: tpu_custom_call.1
= control target key start
LH: loop header
LB: loop body
LE: loop exit
PB: predicated region body
PF: predicated region fallthrough
CT: control target
= control target key end

     0   :  { %9 = vsyncpa [#allocation3], 0  ;;  %s3386_s0 = inlined_call_operand.vmem [shape: f32[2,16,256], index: 0, kind: input, shape index: {}]   ;;  %s3387_s1 = inlined_call_operand.vmem [shape: f32[2,16], index: 1, kind: input, shape index: {}]   ;;  %s3388_s2 = inlined_call_operand.vmem [shape: f32[2,16], index: 2, kind: input, shape index: {}]   ;;  %s3389_s3 = inlined_call_operand.vmem [shape: f32[49,2,1], index: 3, kind: input, shape index: {}]   ;;  %s3390_s4 = inlined_call_operand.hbm [shape: f32[2,16,256], index: 4, kind: output, shape index: {}]  }
   0x1   :  { %11 = vsyncpa [#allocation3 + $0x1], 0  ;;  %s2146_s15 = smov 0   ;;  %s2148_s16 = smov 0  }
   0x2   :  { %s2150_s17 = smov 0   ;;  %s2152_s18 = smov 0  }
   0x3 LB: > { %s2167_s19 = sadd.s32 4294967295, %s2101_s18   ;;  %s1894_s20 = sadd.s32 4294967294, %s2101_s18   ;;  %s2101_s18 = sphi %s2152_s18, %s3459_s18   ;;  %s2097_s17 = sphi %s2150_s17, %s3458_s17   ;;  %s2093_s16 = sphi %s2148_s16, %s3457_s16   ;;  %s2089_s15 = sphi %s2146_s15, %s3456_s15  }
   0x4   : > { %s2171_s21 = sadd.s32 1, %s2101_s18   ;;  %s113_s22 = sadd.s32 1, %s2097_s17 }
   0x5   : > { %s110_s23 = ssub.s32 %s2101_s18, %s2171_s21  ;;  %p123_p0 = scmp.ne.s32.totalorder %s2097_s17, %s2093_s16 }
   0x6   : > { %p111_p1 = scmp.eq.s32.totalorder %s110_s23, 0  ;;  %p124_p2 = scmp.eq.s32.totalorder %s2167_s19, 1 }
   0x7   : > { %p129_p3 = scmp.ne.s32.totalorder %s2093_s16, %s2089_s15  ;;  %p130_p4 = scmp.eq.s32.totalorder %s1894_s20, 1 }
   0x8   : > { %s2182_s24 = scalar_select %p111_p1, %s2097_s17, %s113_s22  }
   0x9   : > { %p2184_p5 = por %p124_p2, %p123_p0  ;;  %p2188_p6 = por %p130_p4, %p129_p3 }
   0xa   : > { %p1897_p7 = scmp.ge.s32.totalorder %s2101_s18, 1  ;;  %p165_p8 = scmp.lt.s32.totalorder %s2101_s18, 3 }
   0xc   : > { %p166_p9 = pnand %p1897_p7, %p165_p8 }
   0xe   : > { %169 = sbr.rel (%p166_p9) target bundleno = 1216 (0x4c0), region = 36 }
  0x13   : > { %v1914_v0 = vld [vmem:[%s3389_s3 + $0xe] sm:$0x3]  ;;  %p191_p10 = scmp.lt.s32.totalorder %s2167_s19, 1  ;;  %v2103_v1 = vmov 0   ;;  %v454_v8 = vld [vmem:[%s3389_s3] sm:$0x3]  ;;  %v216_v58 = vlaneseq }
  0x14   : > { %2028 = vset.pattern.permute.xlu1 %v2103_v1  ;;  %2027 = vset.pattern.permute.xlu0 %v2103_v1  ;;  %v1915_v10 = vld [vmem:[%s3389_s3 + $0x1c] sm:$0x3]  ;;  %v1916_v12 = vld [vmem:[%s3389_s3 + $0x2a] sm:$0x3]  ;;  %v1917_v13 = vld [vmem:[%s3389_s3 + $0x38] sm:$0x3] }
  0x15   : > { %468 = vperm.xlu1 %2028, %v1914_v0   ;;  %s192_s29 = scalar_select %p191_p10, %s2167_s19, 1  ;;  %v1918_v14 = vld [vmem:[%s3389_s3 + $0x46] sm:$0x3]  ;;  %v1919_v15 = vld [vmem:[%s3389_s3 + $0x54] sm:$0x3]  ;;  %v2362_v60 = vand.u32 127, %v216_v58 }
  0x16   : > { %v1921_v16 = vld [vmem:[%s3389_s3 + $0x10] sm:$0x3]  ;;  %v1920_v17 = vld [vmem:[%s3389_s3 + $0x2] sm:$0x3]  ;;  %v1922_v18 = vld [vmem:[%s3389_s3 + $0x1e] sm:$0x3] }
  0x17   : > { %s1969_s30 = sshll.u32 %s192_s29, 5  ;;  %v1927_v19 = vld [vmem:[%s3389_s3 + $0x4] sm:$0x3]  ;;  %v1923_v20 = vld [vmem:[%s3389_s3 + $0x2c] sm:$0x3]  ;;  %v222_v61 = vadd.s32 4294967288, %v2362_v60 }
  0x18   : > { %s195_s7 = scalar_lea.vmem %s3386_s0, %s1969_s30  ;;  %v1934_v21 = vld [vmem:[%s3389_s3 + $0x6] sm:$0x3]  ;;  %v1924_v22 = vld [vmem:[%s3389_s3 + $0x3a] sm:$0x3]  ;;  %v1942_v23 = vld [vmem:[%s3389_s3 + $0x16] sm:$0x3] }
  0x19   : > { %v2202_v2 = vld [vmem:[%s195_s7] sm:$0xff]  ;;  %v2204_v3 = vld [vmem:[%s195_s7 + $0x8] sm:$0xff]  ;;  %v2206_v4 = vld [vmem:[%s195_s7 + $0x10] sm:$0xff]  ;;  %v2365_v62 = vshrl.u32 %v216_v58, 7  ;;  %vm227_vm0 = vcmask 130112   ;;  %vm242_vm1 = vcmask 1040384  }
  0x1a   : > { %v200_v5 = vadd.f32 %v2204_v3, %v2202_v2  ;;  %v2210_v6 = vld [vmem:[%s195_s7 + $0x18] sm:$0xff]  ;;  %v208_v9 = vmax.f32 %v2202_v2, %v2204_v3  ;;  %v1925_v24 = vld [vmem:[%s3389_s3 + $0x48] sm:$0x3]  ;;  %v1926_v26 = vld [vmem:[%s3389_s3 + $0x56] sm:$0x3]  ;;  %vm251_vm2 = vcmask 123904  }
  0x1b   : > { %v203_v7 = vadd.f32 %v2210_v6, %v2206_v4  ;;  %v211_v11 = vmax.f32 %v2206_v4, %v2210_v6  ;;  %v1949_v25 = vld [vmem:[%s3389_s3 + $0x18] sm:$0x3]  ;;  %v1950_v27 = vld [vmem:[%s3389_s3 + $0x26] sm:$0x3]  ;;  %v1928_v28 = vld [vmem:[%s3389_s3 + $0x12] sm:$0x3] }
  0x1c   : > { %201 = vadd.xlane.f32.xlu0 %v200_v5  ;;  %v1945_v29 = vld [vmem:[%s3389_s3 + $0x40] sm:$0x3]  ;;  %v1957_v31 = vld [vmem:[%s3389_s3 + $0x28] sm:$0x3]  ;;  %v1930_v32 = vld [vmem:[%s3389_s3 + $0x2e] sm:$0x3]  ;;  %v225_v5 = vsub.s32 %v222_v61, %v2365_v62 }
  0x1d   : > { %v1929_v30 = vld [vmem:[%s3389_s3 + $0x20] sm:$0x3]  ;;  %v1946_v33 = vld [vmem:[%s3389_s3 + $0x4e] sm:$0x3]  ;;  %v1931_v34 = vld [vmem:[%s3389_s3 + $0x3c] sm:$0x3] }
  0x1e   : > { %v1958_v35 = vld [vmem:[%s3389_s3 + $0x36] sm:$0x3]  ;;  %v1932_v36 = vld [vmem:[%s3389_s3 + $0x4a] sm:$0x3]  ;;  %v1947_v37 = vld [vmem:[%s3389_s3 + $0x5c] sm:$0x3] }
  0x1f   : > { %v1933_v38 = vld [vmem:[%s3389_s3 + $0x58] sm:$0x3]  ;;  %v1959_v39 = vld [vmem:[%s3389_s3 + $0x44] sm:$0x3]  ;;  %v1935_v40 = vld [vmem:[%s3389_s3 + $0x14] sm:$0x3] }
  0x20   : > { %204 = vadd.xlane.f32.xlu0 %v203_v7  ;;  %v1960_v41 = vld [vmem:[%s3389_s3 + $0x52] sm:$0x3]  ;;  %v1936_v42 = vld [vmem:[%s3389_s3 + $0x22] sm:$0x3]  ;;  %v1941_v43 = vld [vmem:[%s3389_s3 + $0x8] sm:$0x3] }
  0x21   : > { %v1937_v44 = vld [vmem:[%s3389_s3 + $0x30] sm:$0x3]  ;;  %v1955_v45 = vld [vmem:[%s3389_s3 + $0xc] sm:$0x3]  ;;  %v1938_v46 = vld [vmem:[%s3389_s3 + $0x3e] sm:$0x3] }
  0x22   : > { %v1943_v47 = vld [vmem:[%s3389_s3 + $0x24] sm:$0x3]  ;;  %v1944_v48 = vld [vmem:[%s3389_s3 + $0x32] sm:$0x3]  ;;  %v1956_v49 = vld [vmem:[%s3389_s3 + $0x1a] sm:$0x3] }
  0x23   : > { %v1951_v50 = vld [vmem:[%s3389_s3 + $0x34] sm:$0x3]  ;;  %v1939_v51 = vld [vmem:[%s3389_s3 + $0x4c] sm:$0x3]  ;;  %v1952_v52 = vld [vmem:[%s3389_s3 + $0x42] sm:$0x3] }
  0x24   : > { %v1940_v53 = vld [vmem:[%s3389_s3 + $0x5a] sm:$0x3]  ;;  %v1953_v54 = vld [vmem:[%s3389_s3 + $0x50] sm:$0x3]  ;;  %v1954_v55 = vld [vmem:[%s3389_s3 + $0x5e] sm:$0x3] }
  0x25   : > { %v1961_v56 = vld [vmem:[%s3389_s3 + $0x60] sm:$0x3]  ;;  %v1948_v57 = vld [vmem:[%s3389_s3 + $0xa] sm:$0x3]  ;;  %s2104_s6 = smov 51   ;;  %vm340_vm3 = vcmask 416768  }
  0x26   : > { %s2105_s7 = smov 112   ;;  %s2106_s8 = smov 96   ;;  %vm483_vm4 = vcmask 916480   ;;  %vm509_vm5 = vcmask 785408   ;;  %vm535_vm6 = vcmask 654336   ;;  %vm561_vm7 = vcmask 523264  }
  0x27   : > { %s2107_s9 = smov 80   ;;  %s2108_s10 = smov 64   ;;  %vm587_vm8 = vcmask 392192   ;;  %vm613_vm9 = vcmask 261120   ;;  %vm808_vm13 = vcmask 1039360   ;;  %vm1001_vm15 = vcmask 1031168  }
  0x28   : > { %s2109_s11 = smov 48   ;;  %s2110_s12 = smov 32  }
  0x29   : > { %s2112_s13 = smov 127   ;;  %s2113_s14 = smov 126  }
  0x2a   : > { %s2114_s20 = smov 125   ;;  %s2115_s22 = smov 123  }
  0x2b   : > { %s2116_s23 = smov 124   ;;  %s2117_s27 = smov 122  }
  0x2c   : > { %s188_s28 = sand.u32 1, %s2093_s16   ;;  %s1970_s30 = sshll.u32 %s2167_s19, 9 }
  0x2d   : > { %s1898_s29 = sshll.u32 %s188_s28, 5  ;;  %s3346_s19 = scalar_lea.sflag [#allocation3], %s188_s28 }
  0x2e   : > { %s190_s5 = scalar_lea.vmem [#allocation2], %s1898_s29 }
  0x36   : > { %457 = vperm.xlu0 %2027, %v454_v8   ;;  %v220_v8 = vsub.s32 %v2362_v60, %v2365_v62 }
  0x39   : > { %209 = vmax.xlane.f32.xlu1 %v208_v9 }
  0x3a   : > { %494 = vperm.xlu0 %2027, %v1915_v10  }
  0x3d   : > { %212 = vmax.xlane.f32.xlu1 %v211_v11 }
  0x3e   : > { %520 = vperm.xlu0 %2027, %v1916_v12   ;;  %v2373_v12 = vsub.s32 0, %v2365_v62 }
  0x40   : > { %3415 = vst [vmem:[#allocation5_spill] sm:$0xff] %v2373_v12 }
  0x42   : > { %546 = vperm.xlu0 %2027, %v1917_v13   ;;  %v244_v13 = vld [vmem:[%s3387_s1] sm:$0x3] }
  0x46   : > { %572 = vperm.xlu0 %2027, %v1918_v14  }
  0x4a   : > { %598 = vperm.xlu0 %2027, %v1919_v15  }
  0x4e   : > { %641 = vperm.xlu1 %2028, %v1921_v16   ;;  %628 = vperm.xlu0 %2027, %v1920_v17  }
  0x52   : > { %668 = vperm.xlu1 %2028, %v1922_v18   ;;  %821 = vperm.xlu0 %2027, %v1927_v19   ;;  %v249_v18 = vrot.slane %v244_v13, %v2373_v12 }
  0x56   : > { %695 = vperm.xlu1 %2028, %v1923_v20   ;;  %1014 = vperm.xlu0 %2027, %v1934_v21  }
  0x5a   : > { %722 = vperm.xlu1 %2028, %v1924_v22   ;;  %1220 = vperm.xlu0 %2027, %v1942_v23  }
  0x5e   : > { %749 = vperm.xlu1 %2028, %v1925_v24   ;;  %1413 = vperm.xlu0 %2027, %v1949_v25   ;;  %v264_v24 = vsub.s32 1, %v2365_v62 }
  0x62   : > { %776 = vperm.xlu1 %2028, %v1926_v26   ;;  %1440 = vperm.xlu0 %2027, %v1950_v27   ;;  %v265_v26 = vrot.slane %v244_v13, %v264_v24 }
  0x66   : > { %834 = vperm.xlu1 %2028, %v1928_v28   ;;  %1301 = vperm.xlu0 %2027, %v1945_v29  }
  0x6a   : > { %861 = vperm.xlu1 %2028, %v1929_v30   ;;  %1633 = vperm.xlu0 %2027, %v1957_v31  }
  0x6e   : > { %888 = vperm.xlu1 %2028, %v1930_v32   ;;  %1328 = vperm.xlu0 %2027, %v1946_v33  }
  0x72   : > { %915 = vperm.xlu1 %2028, %v1931_v34   ;;  %1660 = vperm.xlu0 %2027, %v1958_v35  }
  0x76   : > { %942 = vperm.xlu1 %2028, %v1932_v36   ;;  %1355 = vperm.xlu0 %2027, %v1947_v37  }
  0x7a   : > { %969 = vperm.xlu1 %2028, %v1933_v38   ;;  %1687 = vperm.xlu0 %2027, %v1959_v39  }
  0x7e   : > { %1027 = vperm.xlu1 %2028, %v1935_v40   ;;  %1714 = vperm.xlu0 %2027, %v1960_v41  }
  0x82   : > { %1054 = vperm.xlu1 %2028, %v1936_v42   ;;  %1207 = vperm.xlu0 %2027, %v1941_v43  }
  0x86   : > { %1081 = vperm.xlu1 %2028, %v1937_v44   ;;  %1593 = vperm.xlu0 %2027, %v1955_v45  }
  0x8a   : > { %1108 = vperm.xlu1 %2028, %v1938_v46  }
  0x8e   : > { %1247 = vperm.xlu1 %2028, %v1943_v47  }
  0x90   : > { %v2367_v63 = vpop.permute.xlu1 %468 }
  0x92   : > { %1274 = vperm.xlu1 %2028, %v1944_v48  }
  0x96   : > { %1606 = vperm.xlu1 %2028, %v1956_v49  }
  0x9a   : > { %1467 = vperm.xlu1 %2028, %v1951_v50  }
  0x9e   : > { %1135 = vperm.xlu1 %2028, %v1939_v51  }
  0xa2   : > { %1494 = vperm.xlu1 %2028, %v1952_v52  }
  0xa5   : > { %v202_v59 = vpop.xlane.xlu0 %201 }
  0xa6   : > { %1162 = vperm.xlu1 %2028, %v1940_v53   ;;  %v206_v1 = vmul.f32 0.00390625, %v202_v59 }
  0xa8   : > { %v221_v10 = vrot.slane %v206_v1, %v220_v8 }
  0xa9   : > { %v205_v0 = vpop.xlane.xlu0 %204 }
  0xaa   : > { %1521 = vperm.xlu1 %2028, %v1953_v54   ;;  %v207_v7 = vmul.f32 0.00390625, %v205_v0 }
  0xac   : > { %v226_v11 = vrot.slane %v207_v7, %v225_v5 }
  0xae   : > { %1548 = vperm.xlu1 %2028, %v1954_v55   ;;  %v228_v17 = vsel %vm227_vm0, %v226_v11, %v221_v10 }
  0xb1   : > { %v2393_v33 = vpop.permute.xlu0 %457 }
  0xb2   : > { %1741 = vperm.xlu1 %2028, %v1961_v56  }
  0xb5   : > { %v2397_v35 = vpop.permute.xlu0 %494 }
  0xb6   : > { %1400 = vperm.xlu1 %2028, %v1948_v57  }
  0xb9   : > { %v2401_v37 = vpop.permute.xlu0 %520 }
  0xbd   : > { %v2405_v39 = vpop.permute.xlu0 %546 }
  0xc1   : > { %v2409_v41 = vpop.permute.xlu0 %572 }
  0xc2   : > { %v210_v9 = vpop.xlane.xlu1 %209 }
  0xc3   : > { %v235_v15 = vrot.slane %v210_v9, %v220_v8 }
  0xc5   : > { %v2413_v43 = vpop.permute.xlu0 %598 }
  0xc6   : > { %v213_v14 = vpop.xlane.xlu1 %212 }
  0xc7   : > { %v239_v16 = vrot.slane %v213_v14, %v225_v5 }
  0xc9   : > { %v240_v19 = vsel %vm227_vm0, %v239_v16, %v235_v15  ;;  %v2417_v45 = vpop.permute.xlu0 %628 }
  0xca   : > { %v2379_v20 = vpop.permute.xlu1 %641  ;;  %v243_v21 = vsel %vm242_vm1, %v228_v17, %v240_v19  ;;  %3416 = vst [vmem:[#allocation6_spill] sm:$0xff] %v2417_v45 }
  0xcb   : > { %v250_v22 = vmul.f32 %v249_v18, %v243_v21  ;;  %v266_v28 = vmul.f32 %v265_v26, %v243_v21  ;;  %v245_v18 = vld [vmem:[%s3388_s2] sm:$0x3] }
  0xcc   : > { %v259_v21 = vrot.slane %v245_v18, %v2373_v12 }
  0xcd   : > { %v252_v23 = vsel %vm251_vm2, %v250_v22, 0.0  ;;  %v267_v30 = vsel %vm251_vm2, %v266_v28, 0.0  ;;  %v2421_v47 = vpop.permute.xlu0 %821 }
  0xce   : > { %v2383_v25 = vpop.permute.xlu1 %668  ;;  %253 = vadd.xlane.f32.xlu0 %v252_v23  ;;  %3417 = vst [vmem:[#allocation7_spill] sm:$0xff] %v2421_v47  ;;  %v274_v23 = vrot.slane %v245_v18, %v264_v24 }
  0xd1   : > { %v2425_v49 = vpop.permute.xlu0 %1014 }
  0xd2   : > { %v2385_v27 = vpop.permute.xlu1 %695  ;;  %3418 = vst [vmem:[#allocation8_spill] sm:$0xff] %v2425_v49 }
  0xd5   : > { %v2429_v51 = vpop.permute.xlu0 %1220 }
  0xd6   : > { %v2387_v29 = vpop.permute.xlu1 %722 }
  0xd9   : > { %v2433_v53 = vpop.permute.xlu0 %1413 }
  0xda   : > { %268 = vadd.xlane.f32.xlu1 %v267_v30  ;;  %v2389_v31 = vpop.permute.xlu1 %749 }
  0xdd   : > { %v2437_v55 = vpop.permute.xlu0 %1440 }
  0xde   : > { %v2391_v32 = vpop.permute.xlu1 %776 }
  0xe1   : > { %v2441_v57 = vpop.permute.xlu0 %1301 }
  0xe2   : > { %v2395_v34 = vpop.permute.xlu1 %834 }
  0xe5   : > { %v2445_v59 = vpop.permute.xlu0 %1633 }
  0xe6   : > { %v2399_v36 = vpop.permute.xlu1 %861 }
  0xe9   : > { %v2449_v62 = vpop.permute.xlu0 %1328 }
  0xea   : > { %v2403_v38 = vpop.permute.xlu1 %888 }
  0xed   : > { %v2453_v1 = vpop.permute.xlu0 %1660 }
  0xee   : > { %v2407_v40 = vpop.permute.xlu1 %915  ;;  %3419 = vst [vmem:[#allocation9_spill] sm:$0xff] %v2453_v1 }
  0xf1   : > { %v2457_v7 = vpop.permute.xlu0 %1355 }
  0xf2   : > { %v2411_v42 = vpop.permute.xlu1 %942  ;;  %3420 = vst [vmem:[#allocation10_spill] sm:$0xff] %v2457_v7 }
  0xf5   : > { %v2461_v9 = vpop.permute.xlu0 %1687 }
  0xf6   : > { %v2415_v44 = vpop.permute.xlu1 %969  ;;  %3422 = vst [vmem:[#allocation12_spill] sm:$0xff] %v2461_v9 }
  0xf9   : > { %v2465_v11 = vpop.permute.xlu0 %1714 }
  0xfa   : > { %v2419_v46 = vpop.permute.xlu1 %1027  ;;  %3424 = vst [vmem:[#allocation14_spill] sm:$0xff] %v2465_v11 }
  0xfd   : > { %v2469_v14 = vpop.permute.xlu0 %1207 }
  0xfe   : > { %v2423_v48 = vpop.permute.xlu1 %1054  ;;  %3426 = vst [vmem:[#allocation16_spill] sm:$0xff] %v2469_v14 }
 0x101   : > { %v2473_v16 = vpop.permute.xlu0 %1593 }
 0x102   : > { %v2427_v50 = vpop.permute.xlu1 %1081  ;;  %3428 = vst [vmem:[#allocation18_spill] sm:$0xff] %v2473_v16 }
 0x106   : > { %v2431_v52 = vpop.permute.xlu1 %1108 }
 0x10a   : > { %v2435_v54 = vpop.permute.xlu1 %1247 }
 0x10e   : > { %v2439_v56 = vpop.permute.xlu1 %1274 }
 0x112   : > { %v2443_v58 = vpop.permute.xlu1 %1606 }
 0x116   : > { %v2447_v61 = vpop.permute.xlu1 %1467 }
 0x11a   : > { %v2451_v0 = vpop.permute.xlu1 %1135 }
 0x11e   : > { %v2455_v5 = vpop.permute.xlu1 %1494 }
 0x122   : > { %v2459_v8 = vpop.permute.xlu1 %1162 }
 0x123   : > { %3421 = vst [vmem:[#allocation11_spill] sm:$0xff] %v2459_v8 }
 0x126   : > { %v2463_v10 = vpop.permute.xlu1 %1521 }
 0x127   : > { %3423 = vst [vmem:[#allocation13_spill] sm:$0xff] %v2463_v10 }
 0x12a   : > { %v2467_v13 = vpop.permute.xlu1 %1548 }
 0x12b   : > { %3425 = vst [vmem:[#allocation15_spill] sm:$0xff] %v2467_v13 }
 0x12e   : > { %v2471_v15 = vpop.permute.xlu1 %1741 }
 0x12f   : > { %3427 = vst [vmem:[#allocation17_spill] sm:$0xff] %v2471_v15 }
 0x132   : > { %v2475_v17 = vpop.permute.xlu1 %1400 }
 0x133   : > { %3429 = vst [vmem:[#allocation19_spill] sm:$0xff] %v2475_v17 }
 0x157   : > { %v254_v19 = vpop.xlane.xlu0 %253 }
 0x158   : > { %v255_v22 = vmax.f32 %v254_v19, 0.0 }
 0x15a   : > { %v260_v30 = vmul.f32 %v259_v21, %v255_v22 }
 0x163   : > { %v269_v26 = vpop.xlane.xlu1 %268 }
 0x164   : > { %v270_v28 = vmax.f32 %v269_v26, 0.0 }
 0x166   : > { %v275_v49 = vmul.f32 %v274_v23, %v270_v28 }
 0x168   : > { %v276_v14 = vadd.f32 %v275_v49, %v260_v30 }
 0x16a   : > { %v278_v45 = vrot.slane %v276_v14, 1 }
 0x16c   : > { %v280_v15 = vadd.f32 %v278_v45, %v276_v14 }
 0x16e   : > { %v1901_v11 = vmul.f32 -1.442695, %v280_v15 }
 0x170   : > { %2029 = vpow2.f32 %v1901_v11 }
 0x17d   : > { %v2030_v16 = vpop.eup %2029 }
 0x17e   : > { %v284_v17 = vadd.f32 1.0, %v2030_v16 }
 0x180   : > { %2031 = vrcp.f32 %v284_v17 }
 0x18d   : > { %v2032_v13 = vpop.eup %2031 }
 0x18e   : > { %v290_v9 = vrot.slane %v2032_v13, %v2373_v12 }
 0x190   : > { %296 = vbcast.lane.b32.xlu1 %v290_v9, 264  ;;  %292 = vbcast.lane.b32.xlu0 %v290_v9, 256 }
 0x202   : > { %v297_v47 = vpop.permute.xlu1 %296  ;;  %v293_v19 = vpop.permute.xlu0 %292 }
 0x203   : > { %v2483_v24 = vmul.f32 %v297_v47, %v2206_v4  ;;  %v2486_v18 = vmul.f32 %v297_v47, %v2210_v6  ;;  %v2489_v45 = vmul.f32 %v293_v19, %v2202_v2  ;;  %v2492_v49 = vmul.f32 %v293_v19, %v2204_v3 }
 0x205   : > { %3430 = vst [vmem:[#allocation20_spill] sm:$0xff] %v2483_v24  ;;  %3431 = vst [vmem:[#allocation21_spill] sm:$0xff] %v2486_v18  ;;  %v302_v11 = vadd.f32 %v2483_v24, %v2489_v45  ;;  %v309_v9 = vadd.f32 %v2486_v18, %v2492_v49  ;;  %v318_v13 = vmax.f32 %v2489_v45, %v2483_v24 }
 0x206   : > { %3432 = vst [vmem:[#allocation22_spill] sm:$0xff] %v2489_v45  ;;  %3433 = vst [vmem:[#allocation23_spill] sm:$0xff] %v2492_v49  ;;  %v325_v4 = vmax.f32 %v2492_v49, %v2486_v18 }
 0x207   : > { %v303_v6 = vrot.slane %v302_v11, 4  ;;  %v310_v47 = vrot.slane %v309_v9, 4  ;;  %v319_v14 = vrot.slane %v318_v13, 4 }
 0x208   : > { %v326_v2 = vrot.slane %v325_v4, 4 }
 0x209   : > { %v304_v15 = vadd.f32 %v303_v6, %v302_v11  ;;  %v311_v16 = vadd.f32 %v310_v47, %v309_v9  ;;  %v320_v3 = vmax.f32 %v318_v13, %v319_v14 }
 0x20a   : > { %v327_v17 = vmax.f32 %v325_v4, %v326_v2 }
 0x20b   : > { %v305_v21 = vrot.slane %v304_v15, 2  ;;  %v321_v22 = vrot.slane %v320_v3, 2  ;;  %v312_v23 = vrot.slane %v311_v16, 2 }
 0x20c   : > { %v328_v26 = vrot.slane %v327_v17, 2 }
 0x20d   : > { %v306_v28 = vadd.f32 %v305_v21, %v304_v15  ;;  %v322_v30 = vmax.f32 %v320_v3, %v321_v22  ;;  %v313_v19 = vadd.f32 %v312_v23, %v311_v16 }
 0x20e   : > { %v329_v10 = vmax.f32 %v327_v17, %v328_v26 }
 0x20f   : > { %v307_v12 = vrot.slane %v306_v28, 1  ;;  %v323_v24 = vrot.slane %v322_v30, 1  ;;  %v314_v45 = vrot.slane %v313_v19, 1 }
 0x210   : > { %v330_v1 = vrot.slane %v329_v10, 1 }
 0x211   : > { %v308_v18 = vadd.f32 %v307_v12, %v306_v28  ;;  %v315_v49 = vadd.f32 %v314_v45, %v313_v19  ;;  %v324_v8 = vmax.f32 %v322_v30, %v323_v24 }
 0x212   : > { %v331_v13 = vmax.f32 %v329_v10, %v330_v1 }
 0x213   : > { %v316_v7 = vmul.f32 0.0625, %v308_v18  ;;  %v317_v9 = vmul.f32 0.0625, %v315_v49 }
 0x215   : > { %v332_v11 = vsel %vm242_vm1, %v316_v7, %v324_v8  ;;  %v333_v4 = vsel %vm242_vm1, %v317_v9, %v331_v13 }
 0x216   : > { %336 = vrot.lane.b32.xlu1 %v332_v11, %s2104_s6 }
 0x21a   : > { %338 = vrot.lane.b32.xlu1 %v333_v4, %s2104_s6  ;;  %s1832_s6 = sshll.u32 %s190_s5, 4  ;;  %s3342_s6 = int_to_ptr.vmem [resolvable:$true] %s1832_s6 }
 0x288   : > { %v337_v6 = vpop.permute.xlu1 %336 }
 0x289   : > { %v2504_v47 = vsel %vm340_vm3, 0.0, %v337_v6 }
 0x28a   : > { %v471_v12 = vmul.f32 %v2367_v63, %v2504_v47  ;;  %v497_v10 = vmul.f32 %v2397_v35, %v2504_v47  ;;  %v523_v14 = vmul.f32 %v2401_v37, %v2504_v47  ;;  %v549_v16 = vmul.f32 %v2405_v39, %v2504_v47 }
 0x28b   : > { %v644_v17 = vmul.f32 %v2379_v20, %v2504_v47  ;;  %v575_v21 = vmul.f32 %v2409_v41, %v2504_v47  ;;  %v671_v23 = vmul.f32 %v2383_v25, %v2504_v47  ;;  %v601_v26 = vmul.f32 %v2413_v43, %v2504_v47 }
 0x28c   : > { %477 = vrot.lane.b32.xlu1 %v471_v12, %s2105_s7  ;;  %v339_v24 = vpop.permute.xlu1 %338  ;;  %v698_v30 = vmul.f32 %v2385_v27, %v2504_v47  ;;  %v725_v9 = vmul.f32 %v2387_v29, %v2504_v47  ;;  %v752_v4 = vmul.f32 %v2389_v31, %v2504_v47  ;;  %v779_v12 = vmul.f32 %v2391_v32, %v2504_v47 }
 0x28d   : > { %v2509_v18 = vsel %vm340_vm3, %v339_v24, 0.0  ;;  %v2511_v7 = vsel %vm340_vm3, %v337_v6, %v339_v24  ;;  %vm1387_vm3 = vcmask 1014784  }
 0x28e   : > { %v473_v1 = vmul.f32 %v2367_v63, %v2509_v18  ;;  %v472_v8 = vmul.f32 %v2367_v63, %v2511_v7  ;;  %v498_v45 = vmul.f32 %v2397_v35, %v2511_v7  ;;  %v499_v49 = vmul.f32 %v2397_v35, %v2509_v18 }
 0x28f   : > { %v524_v63 = vmul.f32 %v2401_v37, %v2511_v7  ;;  %v550_v2 = vmul.f32 %v2405_v39, %v2511_v7  ;;  %v525_v35 = vmul.f32 %v2401_v37, %v2509_v18  ;;  %v576_v15 = vmul.f32 %v2409_v41, %v2511_v7 }
 0x290   : > { %481 = vrot.lane.b32.xlu1 %v473_v1, %s2105_s7  ;;  %479 = vrot.lane.b32.xlu0 %v472_v8, %s2105_s7  ;;  %v602_v3 = vmul.f32 %v2413_v43, %v2511_v7  ;;  %v551_v37 = vmul.f32 %v2405_v39, %v2509_v18  ;;  %v646_v22 = vmul.f32 %v2379_v20, %v2509_v18 }
 0x291   : > { %v577_v39 = vmul.f32 %v2409_v41, %v2509_v18  ;;  %v673_v28 = vmul.f32 %v2383_v25, %v2509_v18  ;;  %v603_v41 = vmul.f32 %v2413_v43, %v2509_v18  ;;  %v645_v19 = vmul.f32 %v2379_v20, %v2511_v7 }
 0x292   : > { %v700_v11 = vmul.f32 %v2385_v27, %v2509_v18  ;;  %v672_v43 = vmul.f32 %v2383_v25, %v2511_v7  ;;  %v699_v20 = vmul.f32 %v2385_v27, %v2511_v7  ;;  %v727_v13 = vmul.f32 %v2387_v29, %v2509_v18 }
 0x293   : > { %v726_v25 = vmul.f32 %v2387_v29, %v2511_v7  ;;  %v753_v27 = vmul.f32 %v2389_v31, %v2511_v7  ;;  %v754_v6 = vmul.f32 %v2389_v31, %v2509_v18  ;;  %v780_v29 = vmul.f32 %v2391_v32, %v2511_v7 }
 0x294   : > { %503 = vrot.lane.b32.xlu1 %v497_v10, %s2106_s8  ;;  %505 = vrot.lane.b32.xlu0 %v498_v45, %s2106_s8  ;;  %v838_v24 = vmul.f32 %v2395_v34, %v2511_v7  ;;  %v781_v31 = vmul.f32 %v2391_v32, %v2509_v18  ;;  %v865_v1 = vmul.f32 %v2399_v36, %v2511_v7 }
 0x295   : > { %v837_v8 = vmul.f32 %v2395_v34, %v2504_v47  ;;  %v892_v10 = vmul.f32 %v2403_v38, %v2511_v7  ;;  %v839_v32 = vmul.f32 %v2395_v34, %v2509_v18  ;;  %v919_v45 = vmul.f32 %v2407_v40, %v2511_v7 }
 0x296   : > { %v866_v34 = vmul.f32 %v2399_v36, %v2509_v18 }
 0x298   : > { %507 = vrot.lane.b32.xlu1 %v499_v49, %s2106_s8  ;;  %531 = vrot.lane.b32.xlu0 %v524_v63, %s2107_s9  ;;  %v864_v49 = vmul.f32 %v2399_v36, %v2504_v47  ;;  %v946_v63 = vmul.f32 %v2411_v42, %v2511_v7  ;;  %v893_v36 = vmul.f32 %v2403_v38, %v2509_v18 }
 0x29c   : > { %529 = vrot.lane.b32.xlu1 %v523_v14, %s2107_s9  ;;  %557 = vrot.lane.b32.xlu0 %v550_v2, %s2108_s10  ;;  %v973_v14 = vmul.f32 %v2415_v44, %v2511_v7  ;;  %v891_v2 = vmul.f32 %v2403_v38, %v2504_v47  ;;  %v920_v38 = vmul.f32 %v2407_v40, %v2509_v18 }
 0x2a0   : > { %533 = vrot.lane.b32.xlu1 %v525_v35, %s2107_s9  ;;  %583 = vrot.lane.b32.xlu0 %v576_v15, %s2109_s11  ;;  %v1031_v35 = vmul.f32 %v2419_v46, %v2511_v7  ;;  %v1058_v15 = vmul.f32 %v2423_v48, %v2511_v7 }
 0x2a4   : > { %555 = vrot.lane.b32.xlu1 %v549_v16, %s2108_s10  ;;  %609 = vrot.lane.b32.xlu0 %v602_v3, %s2110_s12  ;;  %v918_v16 = vmul.f32 %v2407_v40, %v2504_v47  ;;  %v1085_v3 = vmul.f32 %v2427_v50, %v2511_v7  ;;  %v947_v40 = vmul.f32 %v2411_v42, %v2509_v18 }
 0x2a8   : > { %559 = vrot.lane.b32.xlu1 %v551_v37, %s2108_s10  ;;  %650 = vrot.lane.b32.xlu0 %v644_v17, %s2105_s7  ;;  %v1223_v37 = vmul.f32 %v2429_v51, %v2504_v47  ;;  %v945_v17 = vmul.f32 %v2411_v42, %v2504_v47  ;;  %v974_v42 = vmul.f32 %v2415_v44, %v2509_v18 }
 0x2ac   : > { %581 = vrot.lane.b32.xlu1 %v575_v21, %s2109_s11  ;;  %654 = vrot.lane.b32.xlu0 %v646_v22, %s2105_s7  ;;  %v1225_v21 = vmul.f32 %v2429_v51, %v2509_v18 }
 0x2b0   : > { %585 = vrot.lane.b32.xlu1 %v577_v39, %s2109_s11  ;;  %677 = vrot.lane.b32.xlu0 %v671_v23, %s2106_s8  ;;  %v1251_v39 = vmul.f32 %v2435_v54, %v2511_v7  ;;  %v972_v23 = vmul.f32 %v2415_v44, %v2504_v47  ;;  %v1278_v44 = vmul.f32 %v2439_v56, %v2511_v7 }
 0x2b4   : > { %607 = vrot.lane.b32.xlu1 %v601_v26, %s2110_s12  ;;  %681 = vrot.lane.b32.xlu0 %v673_v28, %s2106_s8  ;;  %v1416_v26 = vmul.f32 %v2433_v53, %v2504_v47 }
 0x2b8   : > { %611 = vrot.lane.b32.xlu1 %v603_v41, %s2110_s12  ;;  %704 = vrot.lane.b32.xlu0 %v698_v30, %s2107_s9  ;;  %v1418_v30 = vmul.f32 %v2433_v53, %v2509_v18 }
 0x2bc   : > { %652 = vrot.lane.b32.xlu1 %v645_v19, %s2105_s7  ;;  %708 = vrot.lane.b32.xlu0 %v700_v11, %s2107_s9  ;;  %v1030_v11 = vmul.f32 %v2419_v46, %v2504_v47 }
 0x2c0   : > { %679 = vrot.lane.b32.xlu1 %v672_v43, %s2106_s8  ;;  %731 = vrot.lane.b32.xlu0 %v725_v9, %s2108_s10 }
 0x2c4   : > { %706 = vrot.lane.b32.xlu1 %v699_v20, %s2107_s9  ;;  %735 = vrot.lane.b32.xlu0 %v727_v13, %s2108_s10  ;;  %v1032_v20 = vmul.f32 %v2419_v46, %v2509_v18  ;;  %v1445_v46 = vmul.f32 %v2437_v55, %v2509_v18 }
 0x2c8   : > { %733 = vrot.lane.b32.xlu1 %v726_v25, %s2108_s10  ;;  %758 = vrot.lane.b32.xlu0 %v752_v4, %s2109_s11  ;;  %v1443_v25 = vmul.f32 %v2437_v55, %v2504_v47 }
 0x2cc   : > { %760 = vrot.lane.b32.xlu1 %v753_v27, %s2109_s11  ;;  %762 = vrot.lane.b32.xlu0 %v754_v6, %s2109_s11  ;;  %v1057_v27 = vmul.f32 %v2423_v48, %v2504_v47 }
 0x2d0   : > { %787 = vrot.lane.b32.xlu1 %v780_v29, %s2110_s12  ;;  %785 = vrot.lane.b32.xlu0 %v779_v12, %s2110_s12  ;;  %v1059_v12 = vmul.f32 %v2423_v48, %v2509_v18  ;;  %v1111_v48 = vmul.f32 %v2431_v52, %v2504_v47 }
 0x2d4   : > { %845 = vrot.lane.b32.xlu1 %v838_v24, %s2105_s7  ;;  %789 = vrot.lane.b32.xlu0 %v781_v31, %s2110_s12  ;;  %v1610_v31 = vmul.f32 %v2443_v58, %v2511_v7 }
 0x2d8   : > { %872 = vrot.lane.b32.xlu1 %v865_v1, %s2106_s8  ;;  %843 = vrot.lane.b32.xlu0 %v837_v8, %s2105_s7  ;;  %v1084_v8 = vmul.f32 %v2427_v50, %v2504_v47 }
 0x2dc   : > { %899 = vrot.lane.b32.xlu1 %v892_v10, %s2107_s9  ;;  %847 = vrot.lane.b32.xlu0 %v839_v32, %s2105_s7 }
 0x2e0   : > { %926 = vrot.lane.b32.xlu1 %v919_v45, %s2108_s10  ;;  %870 = vrot.lane.b32.xlu0 %v864_v49, %s2106_s8  ;;  %v347_v45 = vadd.s32 128, %v2362_v60  ;;  %v1086_v49 = vmul.f32 %v2427_v50, %v2509_v18  ;;  %v1113_v50 = vmul.f32 %v2431_v52, %v2509_v18 }
 0x2e4   : > { %953 = vrot.lane.b32.xlu1 %v946_v63, %s2109_s11  ;;  %874 = vrot.lane.b32.xlu0 %v866_v34, %s2106_s8 }
 0x2e8   : > { %980 = vrot.lane.b32.xlu1 %v973_v14, %s2110_s12  ;;  %897 = vrot.lane.b32.xlu0 %v891_v2, %s2107_s9  ;;  %v2734_v14 = vand.u32 15, %v2362_v60  ;;  %v460_v2 = vmul.f32 %v2393_v33, %v2504_v47  ;;  %v1224_v60 = vmul.f32 %v2429_v51, %v2511_v7  ;;  %v1250_v51 = vmul.f32 %v2435_v54, %v2504_v47 }
 0x2ec   : > { %1038 = vrot.lane.b32.xlu1 %v1031_v35, %s2105_s7  ;;  %901 = vrot.lane.b32.xlu0 %v893_v36, %s2107_s9 }
 0x2f0   : > { %1065 = vrot.lane.b32.xlu1 %v1058_v15, %s2106_s8  ;;  %924 = vrot.lane.b32.xlu0 %v918_v16, %s2108_s10  ;;  %v2743_v16 = vand.u32 15, %v347_v45 }
 0x2f4   : > { %1092 = vrot.lane.b32.xlu1 %v1085_v3, %s2107_s9  ;;  %928 = vrot.lane.b32.xlu0 %v920_v38, %s2108_s10 }
 0x2f8   : > { %1229 = vrot.lane.b32.xlu1 %v1223_v37, %s2105_s7  ;;  %951 = vrot.lane.b32.xlu0 %v945_v17, %s2109_s11  ;;  %v461_v17 = vmul.f32 %v2393_v33, %v2511_v7 }
 0x2fc   : > { %1233 = vrot.lane.b32.xlu1 %v1225_v21, %s2105_s7  ;;  %955 = vrot.lane.b32.xlu0 %v947_v40, %s2109_s11  ;;  %v372_v40 = vadd.s32 4294967293, %v2734_v14 }
 0x2fe   : > { %v478_v22 = vpop.permute.xlu1 %477  ;;  %vm374_vm10 = vcmp.ge.s32.totalorder %v372_v40, 0  ;;  %v1444_v40 = vmul.f32 %v2437_v55, %v2511_v7  ;;  %v1497_v55 = vmul.f32 %v2455_v5, %v2504_v47 }
 0x300   : > { %1258 = vrot.lane.b32.xlu1 %v1251_v39, %s2106_s8  ;;  %978 = vrot.lane.b32.xlu0 %v972_v23, %s2110_s12  ;;  %v1305_v23 = vmul.f32 %v2441_v57, %v2511_v7 }
 0x302   : > { %v482_v28 = vpop.permute.xlu1 %481  ;;  %v480_v41 = vpop.permute.xlu0 %479 }
 0x303   : > { %v484_v63 = vsel %vm483_vm4, %v478_v22, %v480_v41  ;;  %v485_v3 = vsel %vm483_vm4, %v480_v41, %v482_v28 }
 0x304   : > { %1422 = vrot.lane.b32.xlu1 %v1416_v26, %s2105_s7  ;;  %982 = vrot.lane.b32.xlu0 %v974_v42, %s2110_s12  ;;  %v488_v36 = vadd.f32 %v484_v63, %v460_v2  ;;  %v489_v26 = vadd.f32 %v485_v3, %v461_v17  ;;  %v1279_v3 = vmul.f32 %v2439_v56, %v2509_v18 }
 0x305   : > { %v1140_v17 = vmul.f32 %v2451_v0, %v2509_v18 }
 0x306   : > { %v504_v19 = vpop.permute.xlu1 %503  ;;  %v506_v43 = vpop.permute.xlu0 %505 }
 0x307   : > { %v510_v35 = vsel %vm509_vm5, %v504_v19, %v506_v43 }
 0x308   : > { %1426 = vrot.lane.b32.xlu1 %v1418_v30, %s2105_s7  ;;  %1036 = vrot.lane.b32.xlu0 %v1030_v11, %s2105_s7  ;;  %v514_v21 = vadd.f32 %v510_v35, %v488_v36  ;;  %v1637_v35 = vmul.f32 %v2445_v59, %v2511_v7 }
 0x30a   : > { %v508_v9 = vpop.permute.xlu1 %507  ;;  %v532_v13 = vpop.permute.xlu0 %531 }
 0x30b   : > { %v511_v22 = vsel %vm509_vm5, %v506_v43, %v508_v9  ;;  %v373_v43 = vadd.s32 4294967293, %v2743_v16  ;;  %v1470_v9 = vmul.f32 %v2447_v61, %v2504_v47 }
 0x30c   : > { %1285 = vrot.lane.b32.xlu1 %v1278_v44, %s2107_s9  ;;  %1040 = vrot.lane.b32.xlu0 %v1032_v20, %s2105_s7  ;;  %v515_v19 = vadd.f32 %v511_v22, %v489_v26 }
 0x30d   : > { %vm375_vm11 = vcmp.ge.s32.totalorder %v373_v43, 0 }
 0x30e   : > { %v530_v4 = vpop.permute.xlu1 %529  ;;  %v558_v6 = vpop.permute.xlu0 %557 }
 0x30f   : > { %v536_v38 = vsel %vm535_vm6, %v530_v4, %v532_v13  ;;  %v1252_v4 = vmul.f32 %v2435_v54, %v2509_v18  ;;  %v1472_v54 = vmul.f32 %v2447_v61, %v2509_v18 }
 0x310   : > { %1449 = vrot.lane.b32.xlu1 %v1443_v25, %s2106_s8  ;;  %1063 = vrot.lane.b32.xlu0 %v1057_v27, %s2106_s8  ;;  %v540_v33 = vadd.f32 %v536_v38, %v514_v21 }
 0x312   : > { %v534_v29 = vpop.permute.xlu1 %533  ;;  %v584_v24 = vpop.permute.xlu0 %583 }
 0x313   : > { %v537_v42 = vsel %vm535_vm6, %v532_v13, %v534_v29  ;;  %v3411_v29 = vmov 0.0  }
 0x314   : > { %1453 = vrot.lane.b32.xlu1 %v1445_v46, %s2106_s8  ;;  %1067 = vrot.lane.b32.xlu0 %v1059_v12, %s2106_s8  ;;  %v541_v20 = vadd.f32 %v537_v42, %v515_v19  ;;  %v1902_v12 = vsel %vm374_vm10, 1.0, %v3411_v29  ;;  %v1499_v42 = vmul.f32 %v2455_v5, %v2509_v18  ;;  %v1112_v19 = vmul.f32 %v2431_v52, %v2511_v7  ;;  %v3436_v52 = vld [vmem:[#allocation11_spill] sm:$0xff] }
 0x315   : > { %vm1773_vm10 = vcmask 998400  }
 0x316   : > { %v556_v1 = vpop.permute.xlu1 %555  ;;  %v2721_v10 = vpop.permute.xlu0 %609 }
 0x317   : > { %v562_v39 = vsel %vm561_vm7, %v556_v1, %v558_v6 }
 0x318   : > { %1617 = vrot.lane.b32.xlu1 %v1610_v31, %s2105_s7  ;;  %1090 = vrot.lane.b32.xlu0 %v1084_v8, %s2107_s9  ;;  %v566_v11 = vadd.f32 %v562_v39, %v540_v33  ;;  %v1611_v33 = vmul.f32 %v2443_v58, %v2509_v18 }
 0x31a   : > { %v560_v32 = vpop.permute.xlu1 %559  ;;  %v2731_v34 = vpop.permute.xlu0 %650 }
 0x31b   : > { %v563_v44 = vsel %vm561_vm7, %v558_v6, %v560_v32  ;;  %v1417_v32 = vmul.f32 %v2433_v53, %v2511_v7  ;;  %v1277_v53 = vmul.f32 %v2439_v56, %v2504_v47  ;;  %v1332_v56 = vmul.f32 %v2449_v62, %v2511_v7 }
 0x31c   : > { %1117 = vrot.lane.b32.xlu1 %v1111_v48, %s2108_s10  ;;  %1094 = vrot.lane.b32.xlu0 %v1086_v49, %s2107_s9  ;;  %v567_v31 = vadd.f32 %v563_v44, %v541_v20  ;;  %v1903_v49 = vsel %vm375_vm11, 1.0, %v3411_v29 }
 0x31e   : > { %v582_v15 = vpop.permute.xlu1 %581  ;;  %v2749_v37 = vpop.permute.xlu0 %654 }
 0x31f   : > { %v588_v41 = vsel %vm587_vm8, %v582_v15, %v584_v24 }
 0x320   : > { %1121 = vrot.lane.b32.xlu1 %v1113_v50, %s2108_s10  ;;  %1231 = vrot.lane.b32.xlu0 %v1224_v60, %s2105_s7  ;;  %v592_v13 = vadd.f32 %v588_v41, %v566_v11 }
 0x322   : > { %v586_v28 = vpop.permute.xlu1 %585  ;;  %v2764_v30 = vpop.permute.xlu0 %677 }
 0x323   : > { %v589_v27 = vsel %vm587_vm8, %v584_v24, %v586_v28 }
 0x324   : > { %1312 = vrot.lane.b32.xlu1 %v1305_v23, %s2108_s10  ;;  %1256 = vrot.lane.b32.xlu0 %v1250_v51, %s2106_s8  ;;  %v593_v8 = vadd.f32 %v589_v27, %v567_v31  ;;  %v1609_v51 = vmul.f32 %v2443_v58, %v2504_v47  ;;  %v3435_v58 = vld [vmem:[#allocation9_spill] sm:$0xff]  ;;  %v1471_v31 = vmul.f32 %v2447_v61, %v2511_v7 }
 0x325   : > { %v1664_v43 = vmul.f32 %v3435_v58, %v2511_v7  ;;  %v3438_v61 = vld [vmem:[#allocation13_spill] sm:$0xff] }
 0x326   : > { %v608_v25 = vpop.permute.xlu1 %607  ;;  %v2775_v46 = vpop.permute.xlu0 %681 }
 0x327   : > { %v614_v6 = vsel %vm613_vm9, %v608_v25, %v2721_v10 }
 0x328   : > { %v618_v1 = vadd.f32 %v614_v6, %v592_v13  ;;  %1476 = vrot.lane.b32.xlu1 %v1470_v9, %s2107_s9  ;;  %1260 = vrot.lane.b32.xlu0 %v1252_v4, %s2106_s8  ;;  %v1304_v9 = vmul.f32 %v2441_v57, %v2504_v47  ;;  %v1165_v13 = vmul.f32 %v3436_v52, %v2504_v47 }
 0x329   : > { %v1306_v4 = vmul.f32 %v2441_v57, %v2509_v18  ;;  %v3437_v57 = vld [vmem:[#allocation10_spill] sm:$0xff] }
 0x32a   : > { %v2784_v24 = vmul.f32 %v1902_v12, %v618_v1  ;;  %v612_v48 = vpop.permute.xlu1 %611  ;;  %v2788_v45 = vpop.permute.xlu0 %704  ;;  %v1167_v12 = vmul.f32 %v3436_v52, %v2509_v18 }
 0x32b   : > { %v615_v63 = vsel %vm613_vm9, %v2721_v10, %v612_v48  ;;  %v1138_v10 = vmul.f32 %v2451_v0, %v2504_v47  ;;  %v1636_v48 = vmul.f32 %v2445_v59, %v2504_v47 }
 0x32c   : > { %3434 = vst [vmem:[#allocation24_spill] sm:$0xff] %v2784_v24  ;;  %v619_v2 = vadd.f32 %v615_v63, %v593_v8  ;;  %1480 = vrot.lane.b32.xlu1 %v1472_v54, %s2107_s9  ;;  %1424 = vrot.lane.b32.xlu0 %v1417_v32, %s2105_s7  ;;  %v1359_v54 = vmul.f32 %v3437_v57, %v2511_v7 }
 0x32e   : > { %v2797_v50 = vmul.f32 %v1903_v49, %v619_v2  ;;  %v2799_v36 = vpop.permute.xlu1 %652  ;;  %v2803_v15 = vpop.permute.xlu0 %708  ;;  %v1524_v49 = vmul.f32 %v3438_v61, %v2504_v47 }
 0x330   : > { %1644 = vrot.lane.b32.xlu1 %v1637_v35, %s2106_s8  ;;  %1283 = vrot.lane.b32.xlu0 %v1277_v53, %s2107_s9  ;;  %v1638_v35 = vmul.f32 %v2445_v59, %v2509_v18  ;;  %v3439_v53 = vld [vmem:[#allocation7_spill] sm:$0xff] }
 0x331   : > { %v825_v59 = vmul.f32 %v3439_v53, %v2511_v7 }
 0x332   : > { %v2809_v60 = vpop.permute.xlu1 %679  ;;  %v2813_v38 = vpop.permute.xlu0 %731 }
 0x334   : > { %1144 = vrot.lane.b32.xlu1 %v1138_v10, %s2109_s11  ;;  %1287 = vrot.lane.b32.xlu0 %v1279_v3, %s2107_s9  ;;  %v824_v10 = vmul.f32 %v3439_v53, %v2504_v47 }
 0x336   : > { %v2819_v21 = vpop.permute.xlu1 %706  ;;  %v2823_v22 = vpop.permute.xlu0 %735 }
 0x338   : > { %1148 = vrot.lane.b32.xlu1 %v1140_v17, %s2109_s11  ;;  %1451 = vrot.lane.b32.xlu0 %v1444_v40, %s2106_s8 }
 0x33a   : > { %v2829_v39 = vpop.permute.xlu1 %733  ;;  %v2833_v23 = vpop.permute.xlu0 %758 }
 0x33c   : > { %1339 = vrot.lane.b32.xlu1 %v1332_v56, %s2109_s11  ;;  %1615 = vrot.lane.b32.xlu0 %v1609_v51, %s2105_s7  ;;  %v1526_v56 = vmul.f32 %v3438_v61, %v2509_v18 }
 0x33e   : > { %v2839_v26 = vpop.permute.xlu1 %760  ;;  %v2843_v28 = vpop.permute.xlu0 %762 }
 0x340   : > { %1503 = vrot.lane.b32.xlu1 %v1497_v55, %s2108_s10  ;;  %1619 = vrot.lane.b32.xlu0 %v1611_v33, %s2105_s7  ;;  %v1139_v33 = vmul.f32 %v2451_v0, %v2511_v7  ;;  %v1331_v0 = vmul.f32 %v2449_v62, %v2504_v47 }
 0x342   : > { %v2849_v41 = vpop.permute.xlu1 %787  ;;  %v2853_v11 = vpop.permute.xlu0 %785 }
 0x344   : > { %1507 = vrot.lane.b32.xlu1 %v1499_v42, %s2108_s10  ;;  %1119 = vrot.lane.b32.xlu0 %v1112_v19, %s2108_s10 }
 0x346   : > { %v846_v44 = vpop.permute.xlu1 %845  ;;  %v2861_v20 = vpop.permute.xlu0 %789 }
 0x348   : > { %1671 = vrot.lane.b32.xlu1 %v1664_v43, %s2107_s9  ;;  %1310 = vrot.lane.b32.xlu0 %v1304_v9, %s2108_s10 }
 0x34a   : > { %v873_v25 = vpop.permute.xlu1 %872  ;;  %v844_v27 = vpop.permute.xlu0 %843 }
 0x34b   : > { %v849_v63 = vsel %vm483_vm4, %v844_v27, %v846_v44 }
 0x34c   : > { %1171 = vrot.lane.b32.xlu1 %v1165_v13, %s2110_s12  ;;  %1314 = vrot.lane.b32.xlu0 %v1306_v4, %s2108_s10  ;;  %v854_v40 = vadd.f32 %v849_v63, %v824_v10 }
 0x34e   : > { %v900_v6 = vpop.permute.xlu1 %899  ;;  %v2875_v1 = vpop.permute.xlu0 %847 }
 0x34f   : > { %v850_v51 = vsel %vm483_vm4, %v846_v44, %v2875_v1  ;;  %v3440_v44 = vld [vmem:[#allocation12_spill] sm:$0xff] }
 0x350   : > { %1175 = vrot.lane.b32.xlu1 %v1167_v12, %s2110_s12  ;;  %1478 = vrot.lane.b32.xlu0 %v1471_v31, %s2107_s9  ;;  %v855_v13 = vadd.f32 %v850_v51, %v825_v59  ;;  %v1691_v27 = vmul.f32 %v3440_v44, %v2511_v7  ;;  %v1498_v51 = vmul.f32 %v2455_v5, %v2511_v7 }
 0x352   : > { %v927_v8 = vpop.permute.xlu1 %926  ;;  %v871_v32 = vpop.permute.xlu0 %870 }
 0x353   : > { %v876_v17 = vsel %vm509_vm5, %v871_v32, %v873_v25  ;;  %v3441_v32 = vld [vmem:[#allocation15_spill] sm:$0xff] }
 0x354   : > { %1366 = vrot.lane.b32.xlu1 %v1359_v54, %s2110_s12  ;;  %1642 = vrot.lane.b32.xlu0 %v1636_v48, %s2106_s8  ;;  %v881_v42 = vadd.f32 %v876_v17, %v854_v40 }
 0x356   : > { %v2888_v2 = vpop.permute.xlu1 %953  ;;  %v2894_v3 = vpop.permute.xlu0 %874 }
 0x357   : > { %v877_v43 = vsel %vm509_vm5, %v873_v25, %v2894_v3 }
 0x358   : > { %1530 = vrot.lane.b32.xlu1 %v1524_v49, %s2109_s11  ;;  %1646 = vrot.lane.b32.xlu0 %v1638_v35, %s2106_s8  ;;  %v882_v31 = vadd.f32 %v877_v43, %v855_v13  ;;  %v1551_v49 = vmul.f32 %v3441_v32, %v2504_v47  ;;  %v1333_v35 = vmul.f32 %v2449_v62, %v2509_v18  ;;  %v3443_v43 = vld [vmem:[#allocation6_spill] sm:$0xff] }
 0x35a   : > { %v2903_v55 = vpop.permute.xlu1 %980  ;;  %v898_v19 = vpop.permute.xlu0 %897 }
 0x35b   : > { %v903_v9 = vsel %vm535_vm6, %v898_v19, %v900_v6 }
 0x35c   : > { %1534 = vrot.lane.b32.xlu1 %v1526_v56, %s2109_s11  ;;  %v908_v4 = vadd.f32 %v903_v9, %v881_v42  ;;  %1146 = vrot.lane.b32.xlu0 %v1139_v33, %s2109_s11  ;;  %v3442_v42 = vld [vmem:[#allocation14_spill] sm:$0xff]  ;;  %v633_v9 = vmul.f32 %v3443_v43, %v2509_v18 }
 0x35d   : > { %v1718_v19 = vmul.f32 %v3442_v42, %v2511_v7 }
 0x35e   : > { %v2916_v12 = vpop.permute.xlu1 %1038  ;;  %v902_v54 = vpop.permute.xlu0 %901 }
 0x35f   : > { %v904_v25 = vsel %vm535_vm6, %v900_v6, %v902_v54  ;;  %v1553_v6 = vmul.f32 %v3441_v32, %v2509_v18 }
 0x360   : > { %1698 = vrot.lane.b32.xlu1 %v1691_v27, %s2108_s10  ;;  %v909_v48 = vadd.f32 %v904_v25, %v882_v31  ;;  %1337 = vrot.lane.b32.xlu0 %v1331_v0, %s2109_s11  ;;  %v663_v27 = vadd.f32 %v2749_v37, %v633_v9  ;;  %v3444_v31 = vld [vmem:[#allocation16_spill] sm:$0xff] }
 0x361   : > { %v1212_v25 = vmul.f32 %v3444_v31, %v2509_v18 }
 0x362   : > { %v2925_v63 = vpop.permute.xlu1 %1065  ;;  %v925_v10 = vpop.permute.xlu0 %924 }
 0x363   : > { %v930_v17 = vsel %vm561_vm7, %v925_v10, %v927_v8  ;;  %v826_v10 = vmul.f32 %v3439_v53, %v2509_v18 }
 0x364   : > { %1557 = vrot.lane.b32.xlu1 %v1551_v49, %s2110_s12  ;;  %v935_v40 = vadd.f32 %v930_v17, %v908_v4  ;;  %1341 = vrot.lane.b32.xlu0 %v1333_v35, %s2109_s11  ;;  %v1663_v4 = vmul.f32 %v3435_v58, %v2504_v47  ;;  %v690_v35 = vadd.f32 %v2775_v46, %v663_v27 }
 0x366   : > { %v2934_v56 = vpop.permute.xlu1 %1092  ;;  %v929_v59 = vpop.permute.xlu0 %928 }
 0x367   : > { %v931_v33 = vsel %vm561_vm7, %v927_v8, %v929_v59 }
 0x368   : > { %1561 = vrot.lane.b32.xlu1 %v1553_v6, %s2110_s12  ;;  %v936_v62 = vadd.f32 %v931_v33, %v909_v48  ;;  %1505 = vrot.lane.b32.xlu0 %v1498_v51, %s2108_s10  ;;  %v3445_v48 = vld [vmem:[#allocation17_spill] sm:$0xff]  ;;  %v1665_v6 = vmul.f32 %v3435_v58, %v2509_v18  ;;  %v717_v33 = vadd.f32 %v2803_v15, %v690_v35 }
 0x369   : > { %v1744_v49 = vmul.f32 %v3445_v48, %v2504_v47  ;;  %v1746_v53 = vmul.f32 %v3445_v48, %v2509_v18 }
 0x36a   : > { %v2945_v13 = vpop.permute.xlu1 %1229  ;;  %v952_v5 = vpop.permute.xlu0 %951  ;;  %v744_v58 = vadd.f32 %v2823_v22, %v717_v33 }
 0x36b   : > { %v957_v8 = vsel %vm587_vm8, %v952_v5, %v2888_v2 }
 0x36c   : > { %1725 = vrot.lane.b32.xlu1 %v1718_v19, %s2109_s11  ;;  %v962_v0 = vadd.f32 %v957_v8, %v935_v40  ;;  %1669 = vrot.lane.b32.xlu0 %v1663_v4, %s2107_s9  ;;  %v856_v19 = vadd.f32 %v2875_v1, %v826_v10  ;;  %v1166_v1 = vmul.f32 %v3436_v52, %v2511_v7 }
 0x36d   : > { %v1358_v52 = vmul.f32 %v3437_v57, %v2504_v47 }
 0x36e   : > { %v2961_v17 = vpop.permute.xlu1 %1233  ;;  %v956_v51 = vpop.permute.xlu0 %955  ;;  %v883_v5 = vadd.f32 %v2894_v3, %v856_v19  ;;  %v3446_v19 = vld [vmem:[#allocation19_spill] sm:$0xff] }
 0x36f   : > { %v2966_v40 = vadd.f32 %v2961_v17, %v1212_v25  ;;  %v958_v9 = vsel %vm587_vm8, %v2888_v2, %v956_v51  ;;  %v771_v2 = vadd.f32 %v2843_v28, %v744_v58  ;;  %v1360_v58 = vmul.f32 %v3437_v57, %v2509_v18 }
 0x370   : > { %1750 = vrot.lane.b32.xlu1 %v1744_v49, %s2110_s12  ;;  %v963_v4 = vadd.f32 %v958_v9, %v936_v62  ;;  %1673 = vrot.lane.b32.xlu0 %v1665_v6, %s2107_s9  ;;  %v910_v25 = vadd.f32 %v902_v54, %v883_v5  ;;  %v1525_v57 = vmul.f32 %v3438_v61, %v2511_v7  ;;  %s3340_s9 = scalar_lea.hbm %s3390_s4, %s1970_s30 }
 0x371   : > { %v798_v3 = vadd.f32 %v2861_v20, %v771_v2 }
 0x372   : > { %v2978_v27 = vpop.permute.xlu1 %1258  ;;  %v979_v8 = vpop.permute.xlu0 %978  ;;  %v937_v35 = vadd.f32 %v929_v59, %v910_v25  ;;  %v1405_v59 = vmul.f32 %v3446_v19, %v2509_v18 }
 0x373   : > { %v984_v62 = vsel %vm613_vm9, %v979_v8, %v2903_v55 }
 0x374   : > { %1754 = vrot.lane.b32.xlu1 %v1746_v53, %s2110_s12  ;;  %v2986_v49 = vadd.f32 %v984_v62, %v962_v0  ;;  %1173 = vrot.lane.b32.xlu0 %v1166_v1, %s2110_s12  ;;  %v964_v33 = vadd.f32 %v956_v51, %v937_v35  ;;  %v3447_v51 = vld [vmem:[#allocation8_spill] sm:$0xff] }
 0x375   : > { %v1017_v5 = vmul.f32 %v3447_v51, %v2504_v47  ;;  %v1018_v25 = vmul.f32 %v3447_v51, %v2511_v7 }
 0x376   : > { %v2990_v10 = vpop.permute.xlu1 %1422  ;;  %v983_v6 = vpop.permute.xlu0 %982 }
 0x377   : > { %v985_v54 = vsel %vm613_vm9, %v2903_v55, %v983_v6  ;;  %v991_v9 = vadd.f32 %v983_v6, %v964_v33  ;;  %v1690_v6 = vmul.f32 %v3440_v44, %v2504_v47 }
 0x378   : > { %806 = vrot.lane.b32.xlu1 %v798_v3, %s2112_s13  ;;  %v2997_v0 = vadd.f32 %v985_v54, %v963_v4  ;;  %1364 = vrot.lane.b32.xlu0 %v1358_v52, %s2110_s12 }
 0x37a   : > { %v3002_v53 = vpop.permute.xlu1 %1426  ;;  %v1037_v55 = vpop.permute.xlu0 %1036 }
 0x37b   : > { %v1435_v1 = vadd.f32 %v3002_v53, %v1405_v59  ;;  %v1042_v4 = vsel %vm483_vm4, %v1037_v55, %v2916_v12 }
 0x37c   : > { %999 = vrot.lane.b32.xlu1 %v991_v9, %s2113_s14  ;;  %v1047_v8 = vadd.f32 %v1042_v4, %v1017_v5  ;;  %1368 = vrot.lane.b32.xlu0 %v1360_v58, %s2110_s12  ;;  %v1692_v9 = vmul.f32 %v3440_v44, %v2509_v18 }
 0x37e   : > { %v3013_v2 = vpop.permute.xlu1 %1285  ;;  %v3019_v62 = vpop.permute.xlu0 %1040 }
 0x37f   : > { %v1043_v3 = vsel %vm483_vm4, %v2916_v12, %v3019_v62 }
 0x380   : > { %v1048_v35 = vadd.f32 %v1043_v3, %v1018_v25  ;;  %1532 = vrot.lane.b32.xlu0 %v1525_v57, %s2109_s11 }
 0x382   : > { %v3025_v52 = vpop.permute.xlu1 %1449  ;;  %v1064_v33 = vpop.permute.xlu0 %1063 }
 0x383   : > { %v1069_v61 = vsel %vm509_vm5, %v1064_v33, %v2925_v63  ;;  %v1719_v33 = vmul.f32 %v3442_v42, %v2509_v18 }
 0x384   : > { %v1074_v54 = vadd.f32 %v1069_v61, %v1047_v8  ;;  %1696 = vrot.lane.b32.xlu0 %v1690_v6, %s2108_s10  ;;  %v1552_v8 = vmul.f32 %v3441_v32, %v2511_v7  ;;  %v1210_v61 = vmul.f32 %v3444_v31, %v2504_v47 }
 0x386   : > { %v1454_v59 = vpop.permute.xlu1 %1453  ;;  %v3034_v12 = vpop.permute.xlu0 %1067 }
 0x387   : > { %v3036_v58 = vadd.f32 %v1454_v59, %v1435_v1  ;;  %v1070_v5 = vsel %vm509_vm5, %v2925_v63, %v3034_v12  ;;  %v1717_v63 = vmul.f32 %v3442_v42, %v2504_v47  ;;  %v1745_v42 = vmul.f32 %v3445_v48, %v2511_v7 }
 0x388   : > { %v1075_v55 = vadd.f32 %v1070_v5, %v1048_v35  ;;  %1700 = vrot.lane.b32.xlu0 %v1692_v9, %s2108_s10  ;;  %v1403_v48 = vmul.f32 %v3446_v19, %v2504_v47  ;;  %s2041_s10 = scalar_lea.vmem %s3342_s6, 512 }
 0x389   : > { %p2042_p11 = scmp.ne.s32.totalorder %s3342_s6, %s2041_s10 }
 0x38a   : > { %v3042_v4 = vpop.permute.xlu1 %1617  ;;  %v1091_v57 = vpop.permute.xlu0 %1090 }
 0x38b   : > { %v1096_v44 = vsel %vm535_vm6, %v1091_v57, %v2934_v56  ;;  %p2043_p12 = pnand %p2042_p11, %p2184_p5 }
 0x38c   : > { %v3048_v25 = vadd.f32 %v1096_v44, %v1074_v54  ;;  %1559 = vrot.lane.b32.xlu0 %v1552_v8, %s2110_s12  ;;  %v1211_v54 = vmul.f32 %v3444_v31, %v2511_v7 }
 0x38d   : > { %p2044_p13 = pneg %p2043_p12 }
 0x38e   : > { %v3051_v1 = vpop.permute.xlu1 %1117  ;;  %v3055_v3 = vpop.permute.xlu0 %1094 }
 0x38f   : > { %v1097_v35 = vsel %vm535_vm6, %v2934_v56, %v3055_v3 }
 0x390   : > { %v3060_v32 = vadd.f32 %v1097_v35, %v1075_v55  ;;  %1723 = vrot.lane.b32.xlu0 %v1717_v63, %s2109_s11 }
 0x392   : > { %v3063_v6 = vpop.permute.xlu1 %1121  ;;  %v1232_v9 = vpop.permute.xlu0 %1231 }
 0x393   : > { %v1235_v5 = vsel %vm483_vm4, %v2945_v13, %v1232_v9  ;;  %v1236_v56 = vsel %vm483_vm4, %v1232_v9, %v2961_v17  ;;  %v1404_v9 = vmul.f32 %v3446_v19, %v2511_v7 }
 0x394   : > { %v1240_v55 = vadd.f32 %v1235_v5, %v1210_v61  ;;  %v1241_v8 = vadd.f32 %v1236_v56, %v1211_v54  ;;  %1727 = vrot.lane.b32.xlu0 %v1719_v33, %s2109_s11  ;;  %s2118_s11 = smov [#allocation2]  }
 0x396   : > { %v3076_v57 = vpop.permute.xlu1 %1312  ;;  %v1257_v44 = vpop.permute.xlu0 %1256 }
 0x397   : > { %v1262_v31 = vsel %vm509_vm5, %v1257_v44, %v2978_v27 }
 0x398   : > { %v1267_v63 = vadd.f32 %v1262_v31, %v1240_v55  ;;  %1752 = vrot.lane.b32.xlu0 %v1745_v42, %s2110_s12  ;;  %s2045_s12 = sshll.u32 %s2118_s11, 4  ;;  %s2046_s12 = int_to_ptr.vmem [resolvable:$false] %s2045_s12 }
 0x399   : > { %p2048_p0 = scmp.lt.s32.totalorder %s3342_s6, %s2046_s12 }
 0x39a   : > { %v3083_v13 = vpop.permute.xlu1 %1476  ;;  %v1261_v35 = vpop.permute.xlu0 %1260 }
 0x39b   : > { %v1263_v17 = vsel %vm509_vm5, %v2978_v27, %v1261_v35  ;;  %v1269_v33 = vadd.f32 %v1261_v35, %v2966_v40 }
 0x39c   : > { %v1268_v61 = vadd.f32 %v1263_v17, %v1241_v8 }
 0x39e   : > { %v3088_v54 = vpop.permute.xlu1 %1480  ;;  %v1425_v5 = vpop.permute.xlu0 %1424 }
 0x39f   : > { %v1428_v56 = vsel %vm483_vm4, %v2990_v10, %v1425_v5  ;;  %v1429_v55 = vsel %vm483_vm4, %v1425_v5, %v3002_v53 }
 0x3a0   : > { %v1433_v42 = vadd.f32 %v1428_v56, %v1403_v48  ;;  %v1434_v27 = vadd.f32 %v1429_v55, %v1404_v9 }
 0x3a2   : > { %v3098_v44 = vpop.permute.xlu1 %1644  ;;  %v1284_v40 = vpop.permute.xlu0 %1283 }
 0x3a3   : > { %v1289_v8 = vsel %vm535_vm6, %v1284_v40, %v3013_v2 }
 0x3a4   : > { %v1294_v31 = vadd.f32 %v1289_v8, %v1267_v63  ;;  %v3448_v63 = vld [vmem:[#allocation18_spill] sm:$0xff] }
 0x3a5   : > { %v1596_v40 = vmul.f32 %v3448_v63, %v2504_v47 }
 0x3a6   : > { %v3102_v35 = vpop.permute.xlu1 %1144  ;;  %v1288_v17 = vpop.permute.xlu0 %1287 }
 0x3a7   : > { %v1290_v19 = vsel %vm535_vm6, %v3013_v2, %v1288_v17  ;;  %v3106_v29 = vadd.f32 %v1288_v17, %v1269_v33 }
 0x3a8   : > { %v1295_v10 = vadd.f32 %v1290_v19, %v1268_v61  ;;  %v1598_v61 = vmul.f32 %v3448_v63, %v2509_v18 }
 0x3aa   : > { %v1149_v24 = vpop.permute.xlu1 %1148  ;;  %v1452_v53 = vpop.permute.xlu0 %1451 }
 0x3ab   : > { %v1455_v48 = vsel %vm509_vm5, %v3025_v52, %v1452_v53  ;;  %v1456_v9 = vsel %vm509_vm5, %v1452_v53, %v1454_v59  ;;  %v1597_v52 = vmul.f32 %v3448_v63, %v2511_v7 }
 0x3ac   : > { %v1460_v5 = vadd.f32 %v1455_v48, %v1433_v42  ;;  %v1461_v56 = vadd.f32 %v1456_v9, %v1434_v27  ;;  %v1019_v48 = vmul.f32 %v3447_v51, %v2509_v18 }
 0x3ae   : > { %v3111_v55 = vpop.permute.xlu1 %1339  ;;  %v1616_v8 = vpop.permute.xlu0 %1615  ;;  %v1049_v63 = vadd.f32 %v3019_v62, %v1019_v48 }
 0x3af   : > { %v1621_v2 = vsel %vm483_vm4, %v1616_v8, %v3042_v4 }
 0x3b0   : > { %v1626_v33 = vadd.f32 %v1621_v2, %v1596_v40 }
 0x3b2   : > { %v3119_v17 = vpop.permute.xlu1 %1503  ;;  %v1620_v59 = vpop.permute.xlu0 %1619 }
 0x3b3   : > { %v1622_v42 = vsel %vm483_vm4, %v3042_v4, %v1620_v59  ;;  %v3125_v27 = vadd.f32 %v1620_v59, %v1598_v61 }
 0x3b4   : > { %v1627_v19 = vadd.f32 %v1622_v42, %v1597_v52  ;;  %v1076_v52 = vadd.f32 %v3034_v12, %v1049_v63 }
 0x3b6   : > { %v3127_v53 = vpop.permute.xlu1 %1507  ;;  %v1120_v9 = vpop.permute.xlu0 %1119  ;;  %v1103_v51 = vadd.f32 %v3055_v3, %v1076_v52 }
 0x3b7   : > { %v1123_v40 = vsel %vm561_vm7, %v3051_v1, %v1120_v9  ;;  %v1124_v8 = vsel %vm561_vm7, %v1120_v9, %v3063_v6 }
 0x3b8   : > { %v3137_v2 = vadd.f32 %v1123_v40, %v3048_v25  ;;  %v1129_v4 = vadd.f32 %v1124_v8, %v3060_v32  ;;  %v1130_v62 = vadd.f32 %v3063_v6, %v1103_v51 }
 0x3ba   : > { %v3140_v61 = vpop.permute.xlu1 %1671  ;;  %v1311_v59 = vpop.permute.xlu0 %1310  ;;  %v1157_v32 = vadd.f32 %v1149_v24, %v1130_v62 }
 0x3bb   : > { %v1316_v18 = vsel %vm561_vm7, %v1311_v59, %v3076_v57 }
 0x3bc   : > { %v1321_v1 = vadd.f32 %v1316_v18, %v1294_v31 }
 0x3be   : > { %v3146_v42 = vpop.permute.xlu1 %1171  ;;  %v3149_v48 = vpop.permute.xlu0 %1314 }
 0x3bf   : > { %v1317_v25 = vsel %vm561_vm7, %v3076_v57, %v3149_v48 }
 0x3c0   : > { %v3154_v9 = vadd.f32 %v1317_v25, %v1295_v10 }
 0x3c2   : > { %v3156_v12 = vpop.permute.xlu1 %1175  ;;  %v1479_v40 = vpop.permute.xlu0 %1478 }
 0x3c3   : > { %v1184_v8 = vadd.f32 %v3156_v12, %v1157_v32  ;;  %v1482_v3 = vsel %vm535_vm6, %v3083_v13, %v1479_v40  ;;  %v1483_v6 = vsel %vm535_vm6, %v1479_v40, %v3088_v54 }
 0x3c4   : > { %v1487_v31 = vadd.f32 %v1482_v3, %v1460_v5  ;;  %v1488_v63 = vadd.f32 %v1483_v6, %v1461_v56 }
 0x3c5   : > { %1192 = vrot.lane.b32.xlu0 %v1184_v8, %s2114_s20  ;;  %v632_v8 = vmul.f32 %v3443_v43, %v2511_v7 }
 0x3c6   : > { %v3164_v57 = vpop.permute.xlu1 %1366  ;;  %v1643_v10 = vpop.permute.xlu0 %1642 }
 0x3c7   : > { %v1648_v52 = vsel %vm509_vm5, %v1643_v10, %v3098_v44 }
 0x3c8   : > { %v1653_v59 = vadd.f32 %v1648_v52, %v1626_v33  ;;  %v657_v33 = vsel %vm483_vm4, %v2799_v36, %v2749_v37  ;;  %v711_v37 = vsel %vm535_vm6, %v2819_v21, %v2803_v15 }
 0x3ca   : > { %v3168_v18 = vpop.permute.xlu1 %1530  ;;  %v3170_v51 = vpop.permute.xlu0 %1646 }
 0x3cb   : > { %v1649_v13 = vsel %vm509_vm5, %v3098_v44, %v3170_v51  ;;  %v684_v44 = vsel %vm509_vm5, %v2809_v60, %v2775_v46  ;;  %v738_v46 = vsel %vm561_vm7, %v2829_v39, %v2823_v22 }
 0x3cc   : > { %v1654_v5 = vadd.f32 %v1649_v13, %v1627_v19 }
 0x3ce   : > { %v3175_v56 = vpop.permute.xlu1 %1534  ;;  %v1147_v62 = vpop.permute.xlu0 %1146 }
 0x3cf   : > { %v1151_v25 = vsel %vm587_vm8, %v1147_v62, %v1149_v24  ;;  %v662_v24 = vadd.f32 %v657_v33, %v632_v8 }
 0x3d0   : > { %v3178_v32 = vadd.f32 %v1151_v25, %v1129_v4  ;;  %v1489_v4 = vadd.f32 %v3088_v54, %v3036_v58  ;;  %v765_v58 = vsel %vm587_vm8, %v2839_v26, %v2843_v28 }
 0x3d1   : > { %v689_v7 = vadd.f32 %v684_v44, %v662_v24 }
 0x3d2   : > { %v3183_v40 = vpop.permute.xlu1 %1698  ;;  %v1338_v3 = vpop.permute.xlu0 %1337  ;;  %v1516_v52 = vadd.f32 %v3127_v53, %v1489_v4 }
 0x3d3   : > { %v1343_v19 = vsel %vm587_vm8, %v1338_v3, %v3111_v55  ;;  %v716_v25 = vadd.f32 %v711_v37, %v689_v7  ;;  %v792_v3 = vsel %vm613_vm9, %v2849_v41, %v2861_v20 }
 0x3d4   : > { %v3194_v6 = vadd.f32 %v1343_v19, %v1321_v1  ;;  %v1543_v33 = vadd.f32 %v3175_v56, %v1516_v52 }
 0x3d5   : > { %v743_v15 = vadd.f32 %v738_v46, %v716_v25  ;;  %v631_v25 = vmul.f32 %v3443_v43, %v2504_v47  ;;  %v1323_v47 = vadd.f32 %v3149_v48, %v3106_v29 }
 0x3d6   : > { %v3199_v10 = vpop.permute.xlu1 %1557  ;;  %v1342_v13 = vpop.permute.xlu0 %1341 }
 0x3d7   : > { %v770_v19 = vadd.f32 %v765_v58, %v743_v15  ;;  %v1344_v43 = vsel %vm587_vm8, %v3111_v55, %v1342_v13  ;;  %v791_v55 = vsel %vm613_vm9, %v2853_v11, %v2849_v41 }
 0x3d9   : > { %v797_v28 = vadd.f32 %v792_v3, %v770_v19 }
 0x3da   : > { %v3209_v54 = vpop.permute.xlu1 %1561  ;;  %v1506_v1 = vpop.permute.xlu0 %1505 }
 0x3db   : > { %v1570_v8 = vadd.f32 %v3209_v54, %v1543_v33  ;;  %v1509_v22 = vsel %vm561_vm7, %v3119_v17, %v1506_v1  ;;  %v1510_v44 = vsel %vm561_vm7, %v1506_v1, %v3127_v53  ;;  %v1150_v17 = vsel %vm587_vm8, %v3102_v35, %v1147_v62 }
 0x3dc   : > { %v1514_v24 = vadd.f32 %v1509_v22, %v1487_v31  ;;  %v1515_v4 = vadd.f32 %v1510_v44, %v1488_v63  ;;  %v656_v63 = vsel %vm483_vm4, %v2731_v34, %v2799_v36  ;;  %vm1194_vm4 = vcmask 1022976  }
 0x3dd   : > { %1578 = vrot.lane.b32.xlu0 %v1570_v8, %s2115_s22  ;;  %v661_v62 = vadd.f32 %v656_v63, %v631_v25 }
 0x3de   : > { %v1670_v37 = vpop.permute.xlu0 %1669  ;;  %v1726_v1 = vpop.permute.xlu1 %1725 }
 0x3df   : > { %v1675_v7 = vsel %vm535_vm6, %v1670_v37, %v3140_v61 }
 0x3e0   : > { %v3222_v52 = vadd.f32 %v1675_v7, %v1653_v59  ;;  %v1155_v59 = vadd.f32 %v1150_v17, %v3137_v2  ;;  %v1350_v2 = vadd.f32 %v1342_v13, %v1323_v47 }
 0x3e1   : > { %804 = vrot.lane.b32.xlu0 %v797_v28, %s2112_s13 }
 0x3e2   : > { %v3225_v20 = vpop.permute.xlu0 %1673  ;;  %v1751_v28 = vpop.permute.xlu1 %1750 }
 0x3e3   : > { %v1676_v53 = vsel %vm535_vm6, %v3140_v61, %v3225_v20  ;;  %v683_v61 = vsel %vm509_vm5, %v2764_v30, %v2809_v60  ;;  %v737_v30 = vsel %vm561_vm7, %v2813_v38, %v2829_v39 }
 0x3e4   : > { %v3232_v31 = vadd.f32 %v1676_v53, %v1654_v5  ;;  %v688_v36 = vadd.f32 %v683_v61, %v661_v62  ;;  %v397_v62 = vadd.s32 4294967295, %v2743_v16 }
 0x3e5   : > { %997 = vrot.lane.b32.xlu0 %v2997_v0, %s2113_s14  ;;  %v710_v0 = vsel %vm535_vm6, %v2788_v45, %v2819_v21  ;;  %v764_v45 = vsel %vm587_vm8, %v2833_v23, %v2839_v26  ;;  %v1349_v21 = vadd.f32 %v1344_v43, %v3154_v9 }
 0x3e6   : > { %v1174_v46 = vpop.permute.xlu0 %1173  ;;  %v715_v60 = vadd.f32 %v710_v0, %v688_v36  ;;  %v1755_v53 = vpop.permute.xlu1 %1754  ;;  %vm399_vm14 = vcmp.ge.s32.totalorder %v397_v62, 0 }
 0x3e7   : > { %v1177_v35 = vsel %vm613_vm9, %v3146_v42, %v1174_v46  ;;  %v1178_v26 = vsel %vm613_vm9, %v1174_v46, %v3156_v12 }
 0x3e8   : > { %v1182_v5 = vadd.f32 %v1177_v35, %v1155_v59  ;;  %v742_v33 = vadd.f32 %v737_v30, %v715_v60  ;;  %v1183_v15 = vadd.f32 %v1178_v26, %v3178_v32 }
 0x3ea   : > { %v1365_v34 = vpop.permute.xlu0 %1364  ;;  %1188 = vrot.lane.b32.xlu0 %v1182_v5, %s2114_s20  ;;  %v769_v38 = vadd.f32 %v764_v45, %v742_v33  ;;  %v807_v0 = vpop.permute.xlu1 %806 }
 0x3eb   : > { %v1370_v11 = vsel %vm613_vm9, %v1365_v34, %v3164_v57  ;;  %v3449_v34 = vmov 0.0  }
 0x3ec   : > { %v796_v13 = vadd.f32 %v791_v55, %v769_v38  ;;  %v1375_v22 = vadd.f32 %v1370_v11, %v3194_v6  ;;  %v1907_v60 = vsel %vm399_vm14, 1.0, %v3449_v34 }
 0x3ee   : > { %v1369_v42 = vpop.permute.xlu0 %1368 }
 0x3ef   : > { %v1371_v29 = vsel %vm613_vm9, %v3164_v57, %v1369_v42  ;;  %v1377_v48 = vadd.f32 %v1369_v42, %v1350_v2  ;;  %v1000_v2 = vpop.permute.xlu1 %999 }
 0x3f0   : > { %v1376_v58 = vadd.f32 %v1371_v29, %v1349_v21 }
 0x3f1   : > { %1385 = vrot.lane.b32.xlu1 %v1377_v48, %s2116_s23  ;;  %v384_v48 = vadd.s32 4294967294, %v2734_v14 }
 0x3f2   : > { %v1533_v39 = vpop.permute.xlu0 %1532  ;;  %1383 = vrot.lane.b32.xlu0 %v1376_v58, %s2116_s23  ;;  %v396_v58 = vadd.s32 4294967295, %v2734_v14 }
 0x3f3   : > { %v1536_v41 = vsel %vm587_vm8, %v3168_v18, %v1533_v39  ;;  %v1537_v8 = vsel %vm587_vm8, %v1533_v39, %v3175_v56  ;;  %vm386_vm0 = vcmp.ge.s32.totalorder %v384_v48, 0 }
 0x3f4   : > { %v1541_v3 = vadd.f32 %v1536_v41, %v1514_v24  ;;  %v1542_v44 = vadd.f32 %v1537_v8, %v1515_v4  ;;  %v1904_v38 = vsel %vm386_vm0, 1.0, %v3449_v34  ;;  %vm398_vm1 = vcmp.ge.s32.totalorder %v396_v58, 0  ;;  %v3450_v41 = vld [vmem:[#allocation24_spill] sm:$0xff] }
 0x3f5   : > { %802 = vrot.lane.b32.xlu1 %v796_v13, %s2112_s13  ;;  %v419_v13 = vadd.s32 1, %v2743_v16  ;;  %v418_v8 = vadd.s32 1, %v2734_v14  ;;  %s2047_s13 = scalar_lea.vmem %s2046_s12, 1024 }
 0x3f6   : > { %v1697_v23 = vpop.permute.xlu0 %1696  ;;  %p2049_p1 = scmp.lt.s32.totalorder %s2047_s13, %s2041_s10 }
 0x3f7   : > { %v1702_v56 = vsel %vm561_vm7, %v1697_v23, %v3183_v40  ;;  %vm423_vm2 = vcmp.lt.s32.totalorder %v419_v13, 16  ;;  %vm422_vm5 = vcmp.lt.s32.totalorder %v418_v8, 16  ;;  %v3455_v8 = vld [vmem:[#allocation21_spill] sm:$0xff] }
 0x3f8   : > { %v1707_v7 = vadd.f32 %v1702_v56, %v3222_v52  ;;  %p2050_p2 = por %p2049_p1, %p2048_p0 }
 0x3f9   : > { %995 = vrot.lane.b32.xlu1 %v2986_v49, %s2113_s14 }
 0x3fa   : > { %v1701_v9 = vpop.permute.xlu0 %1700  ;;  %p2051_p3 = pnand %p2050_p2, %p2044_p13 }
 0x3fb   : > { %v1703_v6 = vsel %vm561_vm7, %v3183_v40, %v1701_v9 }
 0x3fc   : > { %v1708_v17 = vadd.f32 %v1703_v6, %v3232_v31  ;;  %v385_v31 = vadd.s32 4294967294, %v2743_v16 }
 0x3fd   : > { %1190 = vrot.lane.b32.xlu1 %v1183_v15, %s2114_s20 }
 0x3fe   : > { %v1560_v12 = vpop.permute.xlu0 %1559  ;;  %vm387_vm12 = vcmp.ge.s32.totalorder %v385_v31, 0 }
 0x3ff   : > { %v1563_v49 = vsel %vm613_vm9, %v3199_v10, %v1560_v12  ;;  %v1564_v32 = vsel %vm613_vm9, %v1560_v12, %v3209_v54  ;;  %v1655_v10 = vadd.f32 %v3170_v51, %v3125_v27  ;;  %v1905_v36 = vsel %vm387_vm12, 1.0, %v3449_v34 }
 0x400   : > { %v1568_v18 = vadd.f32 %v1563_v49, %v1541_v3  ;;  %v1569_v19 = vadd.f32 %v1564_v32, %v1542_v44  ;;  %v430_v44 = vadd.s32 2, %v2734_v14 }
 0x401   : > { %1381 = vrot.lane.b32.xlu1 %v1375_v22, %s2116_s23  ;;  %v1682_v37 = vadd.f32 %v3225_v20, %v1655_v10  ;;  %v1909_v22 = vsel %vm423_vm2, 1.0, %v3449_v34  ;;  %v1908_v10 = vsel %vm422_vm5, 1.0, %v3449_v34 }
 0x402   : > { %v1724_v57 = vpop.permute.xlu0 %1723  ;;  %1574 = vrot.lane.b32.xlu0 %v1568_v18, %s2115_s22  ;;  %vm434_vm6 = vcmp.lt.s32.totalorder %v430_v44, 16 }
 0x403   : > { %v1729_v24 = vsel %vm587_vm8, %v1724_v57, %v1726_v1  ;;  %v1709_v63 = vadd.f32 %v1701_v9, %v1682_v37  ;;  %v1906_v9 = vsel %vm398_vm1, 1.0, %v3449_v34  ;;  %v431_v57 = vadd.s32 2, %v2743_v16 }
 0x404   : > { %v1734_v59 = vadd.f32 %v1729_v24, %v1707_v7 }
 0x405   : > { %1576 = vrot.lane.b32.xlu1 %v1569_v19, %s2115_s22  ;;  %vm435_vm7 = vcmp.lt.s32.totalorder %v431_v57, 16 }
 0x406   : > { %v1728_v54 = vpop.permute.xlu0 %1727 }
 0x407   : > { %v1730_v4 = vsel %vm587_vm8, %v1726_v1, %v1728_v54  ;;  %v1736_v51 = vadd.f32 %v1728_v54, %v1709_v63  ;;  %vm1580_vm8 = vcmask 1006592  }
 0x408   : > { %v1735_v40 = vadd.f32 %v1730_v4, %v1708_v17  ;;  %v1910_v17 = vsel %vm434_vm6, 1.0, %v3449_v34 }
 0x409   : > { %v1763_v20 = vadd.f32 %v1755_v53, %v1736_v51 }
 0x40a   : > { %v1753_v46 = vpop.permute.xlu0 %1752 }
 0x40b   : > { %v1756_v25 = vsel %vm613_vm9, %v1751_v28, %v1753_v46  ;;  %v1757_v27 = vsel %vm613_vm9, %v1753_v46, %v1755_v53  ;;  %v1911_v53 = vsel %vm435_vm7, 1.0, %v3449_v34 }
 0x40c   : > { %v1761_v35 = vadd.f32 %v1756_v25, %v1734_v59  ;;  %v1762_v61 = vadd.f32 %v1757_v27, %v1735_v40  ;;  %v442_v27 = vadd.s32 3, %v2734_v14 }
 0x40e   : > { %1767 = vrot.lane.b32.xlu1 %v1761_v35, %s2117_s27  ;;  %1769 = vrot.lane.b32.xlu0 %v1762_v61, %s2117_s27  ;;  %vm446_vm9 = vcmp.lt.s32.totalorder %v442_v27, 16 }
 0x40f   : > { %v1912_v31 = vsel %vm446_vm9, 1.0, %v3449_v34 }
 0x412   : > { %1771 = vrot.lane.b32.xlu1 %v1763_v20, %s2117_s27 }
 0x437   : > { %v1193_v52 = vpop.permute.xlu0 %1192 }
 0x44f   : > { %v3301_v5 = vpop.permute.xlu0 %1578 }
 0x453   : > { %v805_v47 = vpop.permute.xlu0 %804 }
 0x454   : > { %v810_v43 = vsel %vm808_vm13, %v805_v47, %v807_v0 }
 0x455   : > { %v814_v30 = vmul.f32 %v1905_v36, %v810_v43 }
 0x457   : > { %v816_v45 = vadd.f32 %v814_v30, %v2797_v50  ;;  %v998_v21 = vpop.permute.xlu0 %997 }
 0x458   : > { %v1003_v42 = vsel %vm1001_vm15, %v998_v21, %v1000_v2 }
 0x459   : > { %v1007_v33 = vmul.f32 %v1907_v60, %v1003_v42 }
 0x45b   : > { %v1009_v29 = vadd.f32 %v1007_v33, %v816_v45 }
 0x45c   : > { %v1189_v39 = vpop.permute.xlu0 %1188 }
 0x463   : > { %v1386_v55 = vpop.permute.xlu1 %1385 }
 0x464   : > { %v1384_v15 = vpop.permute.xlu0 %1383 }
 0x465   : > { %v1389_v49 = vsel %vm1387_vm3, %v1384_v15, %v1386_v55 }
 0x466   : > { %v1393_v28 = vmul.f32 %v1909_v22, %v1389_v49 }
 0x467   : > { %v803_v23 = vpop.permute.xlu1 %802 }
 0x468   : > { %v809_v50 = vsel %vm808_vm13, %v803_v23, %v805_v47  ;;  %v3452_v23 = vld [vmem:[#allocation22_spill] sm:$0xff] }
 0x469   : > { %v813_v26 = vmul.f32 %v1904_v38, %v809_v50 }
 0x46b   : > { %v815_v11 = vadd.f32 %v813_v26, %v3450_v41  ;;  %v996_v1 = vpop.permute.xlu1 %995  ;;  %v3453_v26 = vld [vmem:[#allocation20_spill] sm:$0xff] }
 0x46c   : > { %v1002_v3 = vsel %vm1001_vm15, %v996_v1, %v998_v21 }
 0x46d   : > { %v1006_v12 = vmul.f32 %v1906_v9, %v1002_v3 }
 0x46f   : > { %v1008_v32 = vadd.f32 %v1006_v12, %v815_v11  ;;  %v1191_v18 = vpop.permute.xlu1 %1190  ;;  %v3454_v11 = vld [vmem:[#allocation23_spill] sm:$0xff] }
 0x470   : > { %v1196_v19 = vsel %vm1194_vm4, %v1191_v18, %v1193_v52  ;;  %v1195_v6 = vsel %vm1194_vm4, %v1189_v39, %v1191_v18  ;;  %v443_v52 = vadd.s32 3, %v2743_v16  ;;  %v3451_v39 = vld [vmem:[#allocation5_spill] sm:$0xff] }
 0x471   : > { %v1202_v56 = vadd.f32 %v1196_v19, %v1009_v29  ;;  %v1201_v37 = vadd.f32 %v1195_v6, %v1008_v32 }
 0x472   : > { %vm447_vm11 = vcmp.lt.s32.totalorder %v443_v52, 16 }
 0x473   : > { %v1395_v54 = vadd.f32 %v1393_v28, %v1202_v56  ;;  %v1382_v24 = vpop.permute.xlu1 %1381  ;;  %v1913_v43 = vsel %vm447_vm11, 1.0, %v3449_v34 }
 0x474   : > { %v1388_v4 = vsel %vm1387_vm3, %v1382_v24, %v1384_v15  ;;  %v1575_v59 = vpop.permute.xlu0 %1574 }
 0x475   : > { %v1392_v7 = vmul.f32 %v1908_v10, %v1388_v4 }
 0x477   : > { %v1394_v63 = vadd.f32 %v1392_v7, %v1201_v37  ;;  %v1577_v40 = vpop.permute.xlu1 %1576 }
 0x478   : > { %v1581_v46 = vsel %vm1580_vm8, %v1575_v59, %v1577_v40  ;;  %v1582_v25 = vsel %vm1580_vm8, %v1577_v40, %v3301_v5 }
 0x479   : > { %v1585_v51 = vmul.f32 %v1910_v17, %v1581_v46  ;;  %v1586_v35 = vmul.f32 %v1911_v53, %v1582_v25 }
 0x47b   : > { %v1587_v61 = vadd.f32 %v1585_v51, %v1394_v63  ;;  %v1588_v20 = vadd.f32 %v1586_v35, %v1395_v54 }
 0x480   : > { %v1770_v62 = vpop.permute.xlu0 %1769  ;;  %v1768_v0 = vpop.permute.xlu1 %1767 }
 0x481   : > { %v1774_v36 = vsel %vm1773_vm10, %v1768_v0, %v1770_v62 }
 0x482   : > { %v1778_v47 = vmul.f32 %v1912_v31, %v1774_v36 }
 0x484   : > { %v1780_v5 = vadd.f32 %v1778_v47, %v1587_v61  ;;  %v1772_v30 = vpop.permute.xlu1 %1771 }
 0x485   : > { %v1775_v14 = vsel %vm1773_vm10, %v1770_v62, %v1772_v30 }
 0x486   : > { %v1784_v60 = vrot.slane %v1780_v5, 1  ;;  %v1779_v2 = vmul.f32 %v1913_v43, %v1775_v14 }
 0x488   : > { %v1788_v45 = vadd.f32 %v1784_v60, %v1780_v5  ;;  %v1781_v21 = vadd.f32 %v1779_v2, %v1588_v20 }
 0x48a   : > { %v1962_v42 = vmul.f32 -1.442695, %v1788_v45  ;;  %v1785_v16 = vrot.slane %v1781_v21, 1 }
 0x48c   : > { %2033 = vpow2.f32 %v1962_v42  ;;  %v1789_v33 = vadd.f32 %v1785_v16, %v1781_v21 }
 0x48e   : > { %v1963_v29 = vmul.f32 -1.442695, %v1789_v33 }
 0x490   : > { %2035 = vpow2.f32 %v1963_v29 }
 0x499   : > { %v2034_v48 = vpop.eup %2033 }
 0x49a   : > { %v1796_v55 = vadd.f32 1.0, %v2034_v48 }
 0x49c   : > { %2037 = vrcp.f32 %v1796_v55 }
 0x49d   : > { %v2036_v58 = vpop.eup %2035 }
 0x49e   : > { %v1797_v34 = vadd.f32 1.0, %v2036_v58 }
 0x4a0   : > { %2039 = vrcp.f32 %v1797_v34 }
 0x4a9   : > { %v2038_v38 = vpop.eup %2037 }
 0x4aa   : > { %v1805_v13 = vrot.slane %v2038_v38, %v3451_v39 }
 0x4ac   : > { %v1810_v50 = vmul.f32 %v1805_v13, %v3452_v23  ;;  %v1812_v9 = vmul.f32 %v1805_v13, %v3453_v26 }
 0x4ad   : > { %v2040_v15 = vpop.eup %2039 }
 0x4ae   : > { %v1809_v41 = vrot.slane %v2040_v15, %v3451_v39  ;;  %1814 = vst [vmem:[%s190_s5] sm:$0xff] %v1810_v50  ;;  %1816 = vst [vmem:[%s190_s5 + $0x10] sm:$0xff] %v1812_v9 }
 0x4b0   : > { %v1811_v1 = vmul.f32 %v1809_v41, %v3454_v11  ;;  %v1813_v3 = vmul.f32 %v1809_v41, %v3455_v8 }
 0x4b2   : > { %1815 = vst [vmem:[%s190_s5 + $0x8] sm:$0xff] %v1811_v1  ;;  %1817 = vst [vmem:[%s190_s5 + $0x18] sm:$0xff] %v1813_v3 }
 0x4b3   : > { %2054 = shalt.err (!%p2051_p3)
}
 0x4b4   : > { %s2055_s14 = scalar_lea.hbm %s3340_s9, 512  ;;  %s2059_s23 = scalar_lea.hbm %s3390_s4, 1024 }
 0x4b5   : > { %p2056_p4 = scmp.ne.s32.totalorder %s3340_s9, %s2055_s14  ;;  %p2060_p9 = scmp.lt.s32.totalorder %s3340_s9, %s3390_s4 }
 0x4b6   : > { %p2061_p10 = scmp.lt.s32.totalorder %s2059_s23, %s2055_s14 }
 0x4b7   : > { %p2057_p7 = pnand %p2056_p4, %p2184_p5 }
 0x4b8   : > { %p2062_p11 = por %p2061_p10, %p2060_p9 }
 0x4b9   : > { %p2058_p8 = pneg %p2057_p7 }
 0x4bb   : > { %p2063_p12 = pnand %p2062_p11, %p2058_p8 }
 0x4bd   : > { %2066 = shalt.err (!%p2063_p12)
}
 0x4be   : > { %s2119_s29 = smov 256   ;;  %s2120_s30 = smov 16  }
 0x4bf   : > { %1971 = dma.vmem_to_hbm [thread:$0]  (%p2184_p5), %s3342_s6, 512, %s3340_s9, %s3346_s19, %s2119_s29, %s2119_s29, %s2120_s30  }
 0x4c0 PF: > { %p1977_p13 = scmp.ge.s32.totalorder %s2101_s18, 2  ;;  %s1847_s5 = sand.u32 1, %s2089_s15  }
 0x4c1   : > { %s1848_s7 = scalar_lea.sflag [#allocation3], %s1847_s5 }
 0x4c2   : > { %p1974_p0 = pnand %p1977_p13, %p2188_p6 }
 0x4c4   : > { %p1975_p1 = pneg %p1974_p0 }
 0x4c6   : > { %2084 = dma.done.wait (%p1975_p1), %s1848_s7, 512  }
 0x4c7   : > { %2086 = vsyncadd (%p1975_p1), %s1848_s7, 4294966784  ;;  %p14_p2 = scmp.ge.s32.totalorder %s2171_s21, 4   ;;  %s3456_s15 = smov %s2093_s16 }
 0x4c8   : > { %s3457_s16 = smov %s2097_s17  ;;  %s3458_s17 = smov %s2182_s24 }
 0x4c9   : > { %s3459_s18 = smov %s2171_s21  ;;  %16 = sbr.rel (!%p14_p2) target bundleno = 3 (0x3), region = 119 }
 0x4ce   :  { %1853 = vsyncpa [#allocation3], 1 }
 0x4cf   :  { %1855 = vsyncpa [#allocation3 + $0x1], 1 }

</bundles_post_ra>
